<compile_context>
chip_gen: v6e
topology: v6e:2x2x1
jax: 0.10.0
libtpu: 0.0.40
codegen_flags: <defaults>
</compile_context>

<pallas_src>
import functools
import math

import jax
import jax.numpy as jnp
from jax import lax
from jax.experimental import pallas as pl
from jax.experimental.pallas import tpu as pltpu


# row layout of the packed per-layer vector slab (L, 16, E)
_ROW_BQ, _ROW_BK, _ROW_BV, _ROW_BO, _ROW_B2, _ROW_G1, _ROW_BE1, _ROW_G2, _ROW_BE2 = range(9)
_NUM_VEC_ROWS = 16  # padded to a multiple of 8 sublanes


def _layer_norm(x, gamma, beta, eps=1e-5):
    mean = jnp.mean(x, axis=-1, keepdims=True)
    var = jnp.mean((x - mean) ** 2, axis=-1, keepdims=True)
    inv = lax.rsqrt(var + eps)
    return (x - mean) * inv * gamma + beta


def encoder_kernel(num_heads,
                   x_ref,
                   wq_ref, wk_ref, wv_ref, wo_ref,
                   w1_ref, w2_ref, b1_ref, vec_ref,
                   out_ref):
    layer = pl.program_id(0)

    # Initialize the resident activation (output block, constant index_map so it
    # stays in VMEM across all layers) with the PE-added input.
    @pl.when(layer == 0)
    def _():
        out_ref[...] = x_ref[...]

    x = out_ref[...]                                   # (S, E) f32
    S, E = x.shape
    hd = E // num_heads
    scale = 1.0 / math.sqrt(hd)

    # packed per-layer vectors (each (1, E), broadcast over S rows)
    bq = vec_ref[_ROW_BQ:_ROW_BQ + 1, :]
    bk = vec_ref[_ROW_BK:_ROW_BK + 1, :]
    bv = vec_ref[_ROW_BV:_ROW_BV + 1, :]
    bo = vec_ref[_ROW_BO:_ROW_BO + 1, :]
    b2 = vec_ref[_ROW_B2:_ROW_B2 + 1, :]
    g1 = vec_ref[_ROW_G1:_ROW_G1 + 1, :]
    be1 = vec_ref[_ROW_BE1:_ROW_BE1 + 1, :]
    g2 = vec_ref[_ROW_G2:_ROW_G2 + 1, :]
    be2 = vec_ref[_ROW_BE2:_ROW_BE2 + 1, :]

    # --- multi-head self attention -------------------------------------------
    # projections: bf16 weights x bf16 activations, f32 accumulation
    xb = x.astype(jnp.bfloat16)
    q = jnp.dot(xb, wq_ref[...], preferred_element_type=jnp.float32) + bq
    k = jnp.dot(xb, wk_ref[...], preferred_element_type=jnp.float32) + bk
    v = jnp.dot(xb, wv_ref[...], preferred_element_type=jnp.float32) + bv

    attn = jnp.zeros((S, E), jnp.float32)
    for h in range(num_heads):
        lo = h * hd
        qh = q[:, lo:lo + hd]                          # (S, hd)
        kh = k[:, lo:lo + hd]
        vh = v[:, lo:lo + hd]
        # scores: contract the head dim of both operands (transpose folded in)
        s = lax.dot_general(qh, kh, (((1,), (1,)), ((), ())),
                            preferred_element_type=jnp.float32) * scale  # (S, S)
        s = s - jnp.max(s, axis=-1, keepdims=True)
        p = jnp.exp(s)
        p = p * pl.reciprocal(jnp.sum(p, axis=-1, keepdims=True), approx=True)
        oh = jnp.dot(p, vh, preferred_element_type=jnp.float32)          # (S, hd)
        # fold head h straight into the output projection: rows lo:lo+hd of Wo
        wo_h = wo_ref[lo:lo + hd, :]                                     # (hd, E) bf16
        attn = attn + jnp.dot(oh.astype(jnp.bfloat16), wo_h,
                              preferred_element_type=jnp.float32)
    attn = attn + bo

    # post-norm encoder layer (norm_first=False); dropout = identity in eval
    x1 = _layer_norm(x + attn, g1, be1)

    # --- feed-forward: relu(x @ W1 + b1) @ W2 + b2 ----------------------------
    h1 = jnp.maximum(
        jnp.dot(x1.astype(jnp.bfloat16), w1_ref[...],
                preferred_element_type=jnp.float32) + b1_ref[...], 0.0)
    ff = jnp.dot(h1.astype(jnp.bfloat16), w2_ref[...],
                 preferred_element_type=jnp.float32) + b2
    x2 = _layer_norm(x1 + ff, g2, be2)

    out_ref[...] = x2


def init_params(key, embed_dim, num_layers, dim_feedforward=2048):
    E, L, FF = embed_dim, num_layers, dim_feedforward
    ks = jax.random.split(key, 12)

    def w(k, shape, scale):
        return jax.random.normal(k, shape, jnp.float32) * scale

    # weights stored pre-transposed: y = x @ W (+ b)
    return dict(
        wq=w(ks[0], (L, E, E), 0.05),
        wk=w(ks[1], (L, E, E), 0.05),
        wv=w(ks[2], (L, E, E), 0.05),
        wo=w(ks[3], (L, E, E), 0.05),
        w1=w(ks[4], (L, E, FF), 0.05),
        w2=w(ks[5], (L, FF, E), 0.02),
        bq=w(ks[6], (L, E), 0.02),
        bk=w(ks[7], (L, E), 0.02),
        bv=w(ks[8], (L, E), 0.02),
        bo=w(ks[9], (L, E), 0.02),
        b1=w(ks[10], (L, FF), 0.02),
        b2=w(ks[11], (L, E), 0.02),
        g1=jnp.ones((L, E), jnp.float32),
        be1=jnp.zeros((L, E), jnp.float32),
        g2=jnp.ones((L, E), jnp.float32),
        be2=jnp.zeros((L, E), jnp.float32),
    )


def transformer_encoder(x, params, num_heads):
    """x: (N, E) float32 -> (N, 1, E), matching the PyTorch module's forward."""
    S, E = x.shape
    L = params["wq"].shape[0]
    FF = params["w1"].shape[-1]
    assert E % num_heads == 0

    # PositionalEncoding: seq_len after unsqueeze(1) is 1 -> only PE row 0
    # (sin(0)=0 in even slots, cos(0)=1 in odd slots), broadcast over the N rows.
    div_term = jnp.exp(jnp.arange(0, E, 2, dtype=jnp.float32)
                       * (-math.log(10000.0) / E))
    pe_row = jnp.zeros((E,), jnp.float32)
    pe_row = pe_row.at[0::2].set(jnp.sin(0.0 * div_term))
    pe_row = pe_row.at[1::2].set(jnp.cos(0.0 * div_term))
    x = x + pe_row[None, :]

    # stream the big weights as bf16 (f32 accumulation inside the kernel)
    wq = params["wq"].astype(jnp.bfloat16)
    wk = params["wk"].astype(jnp.bfloat16)
    wv = params["wv"].astype(jnp.bfloat16)
    wo = params["wo"].astype(jnp.bfloat16)
    w1 = params["w1"].astype(jnp.bfloat16)
    w2 = params["w2"].astype(jnp.bfloat16)
    b1 = params["b1"].reshape(L, 1, FF)

    # pack the nine tiny per-layer (E,) vectors into one (L, 16, E) slab
    vec_rows = jnp.stack(
        [params[n] for n in
         ("bq", "bk", "bv", "bo", "b2", "g1", "be1", "g2", "be2")], axis=1)
    vecs = jnp.zeros((L, _NUM_VEC_ROWS, E), jnp.float32)
    vecs = vecs.at[:, :vec_rows.shape[1], :].set(vec_rows)

    grid_spec = pltpu.PrefetchScalarGridSpec(
        num_scalar_prefetch=0,
        grid=(L,),
        in_specs=[
            pl.BlockSpec((S, E), lambda l: (0, 0)),                       # x (+pe)
            pl.BlockSpec((None, E, E), lambda l: (l, 0, 0)),              # wq
            pl.BlockSpec((None, E, E), lambda l: (l, 0, 0)),              # wk
            pl.BlockSpec((None, E, E), lambda l: (l, 0, 0)),              # wv
            pl.BlockSpec((None, E, E), lambda l: (l, 0, 0)),              # wo
            pl.BlockSpec((None, E, FF), lambda l: (l, 0, 0)),             # w1
            pl.BlockSpec((None, FF, E), lambda l: (l, 0, 0)),             # w2
            pl.BlockSpec((None, 1, FF), lambda l: (l, 0, 0)),             # b1
            pl.BlockSpec((None, _NUM_VEC_ROWS, E), lambda l: (l, 0, 0)),  # packed vecs
        ],
        out_specs=pl.BlockSpec((S, E), lambda l: (0, 0)),
    )

    out = pl.pallas_call(
        functools.partial(encoder_kernel, num_heads),
        out_shape=jax.ShapeDtypeStruct((S, E), jnp.float32),
        grid_spec=grid_spec,
        compiler_params=pltpu.CompilerParams(
            dimension_semantics=("arbitrary",),
            vmem_limit_bytes=64 * 1024 * 1024,
        ),
    )(x, wq, wk, wv, wo, w1, w2, b1, vecs)

    # restore the singleton batch axis inserted by x.unsqueeze(1): (N, 1, E)
    return out.reshape(S, 1, E)


if __name__ == "__main__":
    key = jax.random.PRNGKey(0)
    N, E, H, L = 8, 32, 4, 2    # rows (= seq after unsqueeze), embed_dim, heads, layers
    k_x, k_p = jax.random.split(key)
    x = jax.random.normal(k_x, (N, E), jnp.float32)
    params = init_params(k_p, E, L)

    out = transformer_encoder(x, params, H)
    out = jax.block_until_ready(out)

    assert out.shape == (N, 1, E), out.shape
    assert bool(jnp.all(jnp.isfinite(out)))
    print("KERNEL_OK")
</pallas_src>

<mosaic_0001>
module attributes {stable_mosaic.version = 11 : i64} {
  func.func @encoder_kernel(%arg0: i32, %arg1: memref<8x32xf32, #tpu.memory_space<vmem>>, %arg2: memref<1x32x32xbf16, #tpu.memory_space<vmem>>, %arg3: memref<1x32x32xbf16, #tpu.memory_space<vmem>>, %arg4: memref<1x32x32xbf16, #tpu.memory_space<vmem>>, %arg5: memref<1x32x32xbf16, #tpu.memory_space<vmem>>, %arg6: memref<1x32x2048xbf16, #tpu.memory_space<vmem>>, %arg7: memref<1x2048x32xbf16, #tpu.memory_space<vmem>>, %arg8: memref<1x1x2048xf32, #tpu.memory_space<vmem>>, %arg9: memref<1x16x32xf32, #tpu.memory_space<vmem>>, %arg10: memref<8x32xf32, #tpu.memory_space<vmem>>) attributes {dimension_semantics = [#tpu.dimension_semantics<arbitrary>], iteration_bounds = array<i64: 2>, scalar_prefetch = 0 : i64, scratch_operands = 0 : i64, tpu.core_type = #tpu.core_type<tc>, window_params = [{pipeline_mode = #tpu.pipeline_mode<synchronous>, transform_indices = @transform_0, window_bounds = array<i64: 8, 32>}, {transform_indices = @transform_1, window_bounds = array<i64: 1, 32, 32>}, {transform_indices = @transform_2, window_bounds = array<i64: 1, 32, 32>}, {transform_indices = @transform_3, window_bounds = array<i64: 1, 32, 32>}, {transform_indices = @transform_4, window_bounds = array<i64: 1, 32, 32>}, {transform_indices = @transform_5, window_bounds = array<i64: 1, 32, 2048>}, {transform_indices = @transform_6, window_bounds = array<i64: 1, 2048, 32>}, {transform_indices = @transform_7, window_bounds = array<i64: 1, 1, 2048>}, {transform_indices = @transform_8, window_bounds = array<i64: 1, 16, 32>}, {pipeline_mode = #tpu.pipeline_mode<synchronous>, transform_indices = @transform_9, window_bounds = array<i64: 8, 32>}]} {
    %c0_i32 = arith.constant 0 : i32
    %0 = arith.cmpi eq, %arg0, %c0_i32 : i32
    %1 = arith.extui %0 : i1 to i32
    %c0_i32_0 = arith.constant 0 : i32
    %2 = arith.cmpi ne, %1, %c0_i32_0 : i32
    scf.if %2 {
      %c0_91 = arith.constant 0 : index
      %c0_92 = arith.constant 0 : index
      %192 = vector.load %arg1[%c0_91, %c0_92] : memref<8x32xf32, #tpu.memory_space<vmem>>, vector<8x32xf32>
      %c0_93 = arith.constant 0 : index
      %c0_94 = arith.constant 0 : index
      %193 = vector.load %arg10[%c0_93, %c0_94] : memref<8x32xf32, #tpu.memory_space<vmem>>, vector<8x32xf32>
      tpu.vector_store %arg10[%c0_93, %c0_94], %192 {strides = array<i32>} : memref<8x32xf32, #tpu.memory_space<vmem>>, vector<8x32xf32>,
    } else {
    }
    %c0 = arith.constant 0 : index
    %c0_1 = arith.constant 0 : index
    %3 = vector.load %arg10[%c0, %c0_1] : memref<8x32xf32, #tpu.memory_space<vmem>>, vector<8x32xf32>
    %c0_2 = arith.constant 0 : index
    %c0_3 = arith.constant 0 : index
    %c0_4 = arith.constant 0 : index
    %4 = vector.load %arg9[%c0_2, %c0_3, %c0_4] : memref<1x16x32xf32, #tpu.memory_space<vmem>>, vector<1x1x32xf32>
    %5 = vector.shape_cast %4 : vector<1x1x32xf32> to vector<1x32xf32>
    %c0_5 = arith.constant 0 : index
    %c1 = arith.constant 1 : index
    %c0_6 = arith.constant 0 : index
    %6 = vector.load %arg9[%c0_5, %c1, %c0_6] : memref<1x16x32xf32, #tpu.memory_space<vmem>>, vector<1x1x32xf32>
    %7 = vector.shape_cast %6 : vector<1x1x32xf32> to vector<1x32xf32>
    %c0_7 = arith.constant 0 : index
    %c2 = arith.constant 2 : index
    %c0_8 = arith.constant 0 : index
    %8 = vector.load %arg9[%c0_7, %c2, %c0_8] : memref<1x16x32xf32, #tpu.memory_space<vmem>>, vector<1x1x32xf32>
    %9 = vector.shape_cast %8 : vector<1x1x32xf32> to vector<1x32xf32>
    %c0_9 = arith.constant 0 : index
    %c3 = arith.constant 3 : index
    %c0_10 = arith.constant 0 : index
    %10 = vector.load %arg9[%c0_9, %c3, %c0_10] : memref<1x16x32xf32, #tpu.memory_space<vmem>>, vector<1x1x32xf32>
    %11 = vector.shape_cast %10 : vector<1x1x32xf32> to vector<1x32xf32>
    %c0_11 = arith.constant 0 : index
    %c4 = arith.constant 4 : index
    %c0_12 = arith.constant 0 : index
    %12 = vector.load %arg9[%c0_11, %c4, %c0_12] : memref<1x16x32xf32, #tpu.memory_space<vmem>>, vector<1x1x32xf32>
    %13 = vector.shape_cast %12 : vector<1x1x32xf32> to vector<1x32xf32>
    %c0_13 = arith.constant 0 : index
    %c5 = arith.constant 5 : index
    %c0_14 = arith.constant 0 : index
    %14 = vector.load %arg9[%c0_13, %c5, %c0_14] : memref<1x16x32xf32, #tpu.memory_space<vmem>>, vector<1x1x32xf32>
    %15 = vector.shape_cast %14 : vector<1x1x32xf32> to vector<1x32xf32>
    %c0_15 = arith.constant 0 : index
    %c6 = arith.constant 6 : index
    %c0_16 = arith.constant 0 : index
    %16 = vector.load %arg9[%c0_15, %c6, %c0_16] : memref<1x16x32xf32, #tpu.memory_space<vmem>>, vector<1x1x32xf32>
    %17 = vector.shape_cast %16 : vector<1x1x32xf32> to vector<1x32xf32>
    %c0_17 = arith.constant 0 : index
    %c7 = arith.constant 7 : index
    %c0_18 = arith.constant 0 : index
    %18 = vector.load %arg9[%c0_17, %c7, %c0_18] : memref<1x16x32xf32, #tpu.memory_space<vmem>>, vector<1x1x32xf32>
    %19 = vector.shape_cast %18 : vector<1x1x32xf32> to vector<1x32xf32>
    %c0_19 = arith.constant 0 : index
    %c8 = arith.constant 8 : index
    %c0_20 = arith.constant 0 : index
    %20 = vector.load %arg9[%c0_19, %c8, %c0_20] : memref<1x16x32xf32, #tpu.memory_space<vmem>>, vector<1x1x32xf32>
    %21 = vector.shape_cast %20 : vector<1x1x32xf32> to vector<1x32xf32>
    %22 = arith.truncf %3 : vector<8x32xf32> to vector<8x32xbf16>
    %c0_21 = arith.constant 0 : index
    %c0_22 = arith.constant 0 : index
    %c0_23 = arith.constant 0 : index
    %23 = vector.load %arg2[%c0_21, %c0_22, %c0_23] : memref<1x32x32xbf16, #tpu.memory_space<vmem>>, vector<1x32x32xbf16>
    %24 = vector.shape_cast %23 : vector<1x32x32xbf16> to vector<32x32xbf16>
    %cst = arith.constant dense<0.000000e+00> : vector<8x32xf32>
    %25 = tpu.matmul %22, %24, %cst {dimension_numbers = #tpu.dot_dimension_numbers<[1], [0], [0], [1], [0, 0, 1, 1], [], []>} : vector<8x32xbf16>, vector<32x32xbf16>, vector<8x32xf32> -> vector<8x32xf32>
    %26 = vector.broadcast %5 : vector<1x32xf32> to vector<8x32xf32>
    %27 = arith.addf %25, %26 : vector<8x32xf32>
    %c0_24 = arith.constant 0 : index
    %c0_25 = arith.constant 0 : index
    %c0_26 = arith.constant 0 : index
    %28 = vector.load %arg3[%c0_24, %c0_25, %c0_26] : memref<1x32x32xbf16, #tpu.memory_space<vmem>>, vector<1x32x32xbf16>
    %29 = vector.shape_cast %28 : vector<1x32x32xbf16> to vector<32x32xbf16>
    %cst_27 = arith.constant dense<0.000000e+00> : vector<8x32xf32>
    %30 = tpu.matmul %22, %29, %cst_27 {dimension_numbers = #tpu.dot_dimension_numbers<[1], [0], [0], [1], [0, 0, 1, 1], [], []>} : vector<8x32xbf16>, vector<32x32xbf16>, vector<8x32xf32> -> vector<8x32xf32>
    %31 = vector.broadcast %7 : vector<1x32xf32> to vector<8x32xf32>
    %32 = arith.addf %30, %31 : vector<8x32xf32>
    %c0_28 = arith.constant 0 : index
    %c0_29 = arith.constant 0 : index
    %c0_30 = arith.constant 0 : index
    %33 = vector.load %arg4[%c0_28, %c0_29, %c0_30] : memref<1x32x32xbf16, #tpu.memory_space<vmem>>, vector<1x32x32xbf16>
    %34 = vector.shape_cast %33 : vector<1x32x32xbf16> to vector<32x32xbf16>
    %cst_31 = arith.constant dense<0.000000e+00> : vector<8x32xf32>
    %35 = tpu.matmul %22, %34, %cst_31 {dimension_numbers = #tpu.dot_dimension_numbers<[1], [0], [0], [1], [0, 0, 1, 1], [], []>} : vector<8x32xbf16>, vector<32x32xbf16>, vector<8x32xf32> -> vector<8x32xf32>
    %36 = vector.broadcast %9 : vector<1x32xf32> to vector<8x32xf32>
    %37 = arith.addf %35, %36 : vector<8x32xf32>
    %cst_32 = arith.constant 0.000000e+00 : f32
    %38 = vector.broadcast %cst_32 : f32 to vector<8x32xf32>
    %39 = vector.extract_strided_slice %27 {offsets = [0, 0], sizes = [8, 8], strides = [1, 1]} : vector<8x32xf32> to vector<8x8xf32>
    %40 = vector.extract_strided_slice %32 {offsets = [0, 0], sizes = [8, 8], strides = [1, 1]} : vector<8x32xf32> to vector<8x8xf32>
    %41 = vector.extract_strided_slice %37 {offsets = [0, 0], sizes = [8, 8], strides = [1, 1]} : vector<8x32xf32> to vector<8x8xf32>
    %cst_33 = arith.constant dense<0.000000e+00> : vector<8x8xf32>
    %42 = tpu.matmul %39, %40, %cst_33 {dimension_numbers = #tpu.dot_dimension_numbers<[1], [1], [0], [0], [0, 0, 1, 0], [], []>} : vector<8x8xf32>, vector<8x8xf32>, vector<8x8xf32> -> vector<8x8xf32>
    %cst_34 = arith.constant 0.353553385 : f32
    %43 = vector.broadcast %cst_34 : f32 to vector<8x8xf32>
    %44 = arith.mulf %42, %43 : vector<8x8xf32>
    %cst_35 = arith.constant dense<0xFF800000> : vector<8xf32>
    %45 = vector.multi_reduction <maximumf>, %44, %cst_35 [1] : vector<8x8xf32> to vector<8xf32>
    %46 = vector.shape_cast %45 : vector<8xf32> to vector<8x1xf32>
    %47 = vector.broadcast %46 : vector<8x1xf32> to vector<8x8xf32>
    %48 = arith.subf %44, %47 : vector<8x8xf32>
    %49 = math.exp %48 : vector<8x8xf32>
    %cst_36 = arith.constant dense<0.000000e+00> : vector<8xf32>
    %50 = vector.multi_reduction <add>, %49, %cst_36 [1] : vector<8x8xf32> to vector<8xf32>
    %51 = vector.shape_cast %50 : vector<8xf32> to vector<8x1xf32>
    %52 = tpu.reciprocal %51 {approx = true} : vector<8x1xf32> -> vector<8x1xf32>
    %53 = vector.broadcast %52 : vector<8x1xf32> to vector<8x8xf32>
    %54 = arith.mulf %49, %53 : vector<8x8xf32>
    %cst_37 = arith.constant dense<0.000000e+00> : vector<8x8xf32>
    %55 = tpu.matmul %54, %41, %cst_37 {dimension_numbers = #tpu.dot_dimension_numbers<[1], [0], [0], [1], [0, 0, 1, 1], [], []>} : vector<8x8xf32>, vector<8x8xf32>, vector<8x8xf32> -> vector<8x8xf32>
    %c0_38 = arith.constant 0 : index
    %c0_39 = arith.constant 0 : index
    %c0_40 = arith.constant 0 : index
    %56 = vector.load %arg5[%c0_38, %c0_39, %c0_40] : memref<1x32x32xbf16, #tpu.memory_space<vmem>>, vector<1x8x32xbf16>
    %57 = vector.shape_cast %56 : vector<1x8x32xbf16> to vector<8x32xbf16>
    %58 = arith.truncf %55 : vector<8x8xf32> to vector<8x8xbf16>
    %cst_41 = arith.constant dense<0.000000e+00> : vector<8x32xf32>
    %59 = tpu.matmul %58, %57, %cst_41 {dimension_numbers = #tpu.dot_dimension_numbers<[1], [0], [0], [1], [0, 0, 1, 1], [], []>} : vector<8x8xbf16>, vector<8x32xbf16>, vector<8x32xf32> -> vector<8x32xf32>
    %60 = arith.addf %38, %59 : vector<8x32xf32>
    %61 = vector.extract_strided_slice %27 {offsets = [0, 8], sizes = [8, 8], strides = [1, 1]} : vector<8x32xf32> to vector<8x8xf32>
    %62 = vector.extract_strided_slice %32 {offsets = [0, 8], sizes = [8, 8], strides = [1, 1]} : vector<8x32xf32> to vector<8x8xf32>
    %63 = vector.extract_strided_slice %37 {offsets = [0, 8], sizes = [8, 8], strides = [1, 1]} : vector<8x32xf32> to vector<8x8xf32>
    %cst_42 = arith.constant dense<0.000000e+00> : vector<8x8xf32>
    %64 = tpu.matmul %61, %62, %cst_42 {dimension_numbers = #tpu.dot_dimension_numbers<[1], [1], [0], [0], [0, 0, 1, 0], [], []>} : vector<8x8xf32>, vector<8x8xf32>, vector<8x8xf32> -> vector<8x8xf32>
    %cst_43 = arith.constant 0.353553385 : f32
    %65 = vector.broadcast %cst_43 : f32 to vector<8x8xf32>
    %66 = arith.mulf %64, %65 : vector<8x8xf32>
    %cst_44 = arith.constant dense<0xFF800000> : vector<8xf32>
    %67 = vector.multi_reduction <maximumf>, %66, %cst_44 [1] : vector<8x8xf32> to vector<8xf32>
    %68 = vector.shape_cast %67 : vector<8xf32> to vector<8x1xf32>
    %69 = vector.broadcast %68 : vector<8x1xf32> to vector<8x8xf32>
    %70 = arith.subf %66, %69 : vector<8x8xf32>
    %71 = math.exp %70 : vector<8x8xf32>
    %cst_45 = arith.constant dense<0.000000e+00> : vector<8xf32>
    %72 = vector.multi_reduction <add>, %71, %cst_45 [1] : vector<8x8xf32> to vector<8xf32>
    %73 = vector.shape_cast %72 : vector<8xf32> to vector<8x1xf32>
    %74 = tpu.reciprocal %73 {approx = true} : vector<8x1xf32> -> vector<8x1xf32>
    %75 = vector.broadcast %74 : vector<8x1xf32> to vector<8x8xf32>
    %76 = arith.mulf %71, %75 : vector<8x8xf32>
    %cst_46 = arith.constant dense<0.000000e+00> : vector<8x8xf32>
    %77 = tpu.matmul %76, %63, %cst_46 {dimension_numbers = #tpu.dot_dimension_numbers<[1], [0], [0], [1], [0, 0, 1, 1], [], []>} : vector<8x8xf32>, vector<8x8xf32>, vector<8x8xf32> -> vector<8x8xf32>
    %c0_47 = arith.constant 0 : index
    %c8_48 = arith.constant 8 : index
    %c0_49 = arith.constant 0 : index
    %78 = vector.load %arg5[%c0_47, %c8_48, %c0_49] : memref<1x32x32xbf16, #tpu.memory_space<vmem>>, vector<1x8x32xbf16>
    %79 = vector.shape_cast %78 : vector<1x8x32xbf16> to vector<8x32xbf16>
    %80 = arith.truncf %77 : vector<8x8xf32> to vector<8x8xbf16>
    %cst_50 = arith.constant dense<0.000000e+00> : vector<8x32xf32>
    %81 = tpu.matmul %80, %79, %cst_50 {dimension_numbers = #tpu.dot_dimension_numbers<[1], [0], [0], [1], [0, 0, 1, 1], [], []>} : vector<8x8xbf16>, vector<8x32xbf16>, vector<8x32xf32> -> vector<8x32xf32>
    %82 = arith.addf %60, %81 : vector<8x32xf32>
    %83 = vector.extract_strided_slice %27 {offsets = [0, 16], sizes = [8, 8], strides = [1, 1]} : vector<8x32xf32> to vector<8x8xf32>
    %84 = vector.extract_strided_slice %32 {offsets = [0, 16], sizes = [8, 8], strides = [1, 1]} : vector<8x32xf32> to vector<8x8xf32>
    %85 = vector.extract_strided_slice %37 {offsets = [0, 16], sizes = [8, 8], strides = [1, 1]} : vector<8x32xf32> to vector<8x8xf32>
    %cst_51 = arith.constant dense<0.000000e+00> : vector<8x8xf32>
    %86 = tpu.matmul %83, %84, %cst_51 {dimension_numbers = #tpu.dot_dimension_numbers<[1], [1], [0], [0], [0, 0, 1, 0], [], []>} : vector<8x8xf32>, vector<8x8xf32>, vector<8x8xf32> -> vector<8x8xf32>
    %cst_52 = arith.constant 0.353553385 : f32
    %87 = vector.broadcast %cst_52 : f32 to vector<8x8xf32>
    %88 = arith.mulf %86, %87 : vector<8x8xf32>
    %cst_53 = arith.constant dense<0xFF800000> : vector<8xf32>
    %89 = vector.multi_reduction <maximumf>, %88, %cst_53 [1] : vector<8x8xf32> to vector<8xf32>
    %90 = vector.shape_cast %89 : vector<8xf32> to vector<8x1xf32>
    %91 = vector.broadcast %90 : vector<8x1xf32> to vector<8x8xf32>
    %92 = arith.subf %88, %91 : vector<8x8xf32>
    %93 = math.exp %92 : vector<8x8xf32>
    %cst_54 = arith.constant dense<0.000000e+00> : vector<8xf32>
    %94 = vector.multi_reduction <add>, %93, %cst_54 [1] : vector<8x8xf32> to vector<8xf32>
    %95 = vector.shape_cast %94 : vector<8xf32> to vector<8x1xf32>
    %96 = tpu.reciprocal %95 {approx = true} : vector<8x1xf32> -> vector<8x1xf32>
    %97 = vector.broadcast %96 : vector<8x1xf32> to vector<8x8xf32>
    %98 = arith.mulf %93, %97 : vector<8x8xf32>
    %cst_55 = arith.constant dense<0.000000e+00> : vector<8x8xf32>
    %99 = tpu.matmul %98, %85, %cst_55 {dimension_numbers = #tpu.dot_dimension_numbers<[1], [0], [0], [1], [0, 0, 1, 1], [], []>} : vector<8x8xf32>, vector<8x8xf32>, vector<8x8xf32> -> vector<8x8xf32>
    %c0_56 = arith.constant 0 : index
    %c16 = arith.constant 16 : index
    %c0_57 = arith.constant 0 : index
    %100 = vector.load %arg5[%c0_56, %c16, %c0_57] : memref<1x32x32xbf16, #tpu.memory_space<vmem>>, vector<1x8x32xbf16>
    %101 = vector.shape_cast %100 : vector<1x8x32xbf16> to vector<8x32xbf16>
    %102 = arith.truncf %99 : vector<8x8xf32> to vector<8x8xbf16>
    %cst_58 = arith.constant dense<0.000000e+00> : vector<8x32xf32>
    %103 = tpu.matmul %102, %101, %cst_58 {dimension_numbers = #tpu.dot_dimension_numbers<[1], [0], [0], [1], [0, 0, 1, 1], [], []>} : vector<8x8xbf16>, vector<8x32xbf16>, vector<8x32xf32> -> vector<8x32xf32>
    %104 = arith.addf %82, %103 : vector<8x32xf32>
    %105 = vector.extract_strided_slice %27 {offsets = [0, 24], sizes = [8, 8], strides = [1, 1]} : vector<8x32xf32> to vector<8x8xf32>
    %106 = vector.extract_strided_slice %32 {offsets = [0, 24], sizes = [8, 8], strides = [1, 1]} : vector<8x32xf32> to vector<8x8xf32>
    %107 = vector.extract_strided_slice %37 {offsets = [0, 24], sizes = [8, 8], strides = [1, 1]} : vector<8x32xf32> to vector<8x8xf32>
    %cst_59 = arith.constant dense<0.000000e+00> : vector<8x8xf32>
    %108 = tpu.matmul %105, %106, %cst_59 {dimension_numbers = #tpu.dot_dimension_numbers<[1], [1], [0], [0], [0, 0, 1, 0], [], []>} : vector<8x8xf32>, vector<8x8xf32>, vector<8x8xf32> -> vector<8x8xf32>
    %cst_60 = arith.constant 0.353553385 : f32
    %109 = vector.broadcast %cst_60 : f32 to vector<8x8xf32>
    %110 = arith.mulf %108, %109 : vector<8x8xf32>
    %cst_61 = arith.constant dense<0xFF800000> : vector<8xf32>
    %111 = vector.multi_reduction <maximumf>, %110, %cst_61 [1] : vector<8x8xf32> to vector<8xf32>
    %112 = vector.shape_cast %111 : vector<8xf32> to vector<8x1xf32>
    %113 = vector.broadcast %112 : vector<8x1xf32> to vector<8x8xf32>
    %114 = arith.subf %110, %113 : vector<8x8xf32>
    %115 = math.exp %114 : vector<8x8xf32>
    %cst_62 = arith.constant dense<0.000000e+00> : vector<8xf32>
    %116 = vector.multi_reduction <add>, %115, %cst_62 [1] : vector<8x8xf32> to vector<8xf32>
    %117 = vector.shape_cast %116 : vector<8xf32> to vector<8x1xf32>
    %118 = tpu.reciprocal %117 {approx = true} : vector<8x1xf32> -> vector<8x1xf32>
    %119 = vector.broadcast %118 : vector<8x1xf32> to vector<8x8xf32>
    %120 = arith.mulf %115, %119 : vector<8x8xf32>
    %cst_63 = arith.constant dense<0.000000e+00> : vector<8x8xf32>
    %121 = tpu.matmul %120, %107, %cst_63 {dimension_numbers = #tpu.dot_dimension_numbers<[1], [0], [0], [1], [0, 0, 1, 1], [], []>} : vector<8x8xf32>, vector<8x8xf32>, vector<8x8xf32> -> vector<8x8xf32>
    %c0_64 = arith.constant 0 : index
    %c24 = arith.constant 24 : index
    %c0_65 = arith.constant 0 : index
    %122 = vector.load %arg5[%c0_64, %c24, %c0_65] : memref<1x32x32xbf16, #tpu.memory_space<vmem>>, vector<1x8x32xbf16>
    %123 = vector.shape_cast %122 : vector<1x8x32xbf16> to vector<8x32xbf16>
    %124 = arith.truncf %121 : vector<8x8xf32> to vector<8x8xbf16>
    %cst_66 = arith.constant dense<0.000000e+00> : vector<8x32xf32>
    %125 = tpu.matmul %124, %123, %cst_66 {dimension_numbers = #tpu.dot_dimension_numbers<[1], [0], [0], [1], [0, 0, 1, 1], [], []>} : vector<8x8xbf16>, vector<8x32xbf16>, vector<8x32xf32> -> vector<8x32xf32>
    %126 = arith.addf %104, %125 : vector<8x32xf32>
    %127 = vector.broadcast %11 : vector<1x32xf32> to vector<8x32xf32>
    %128 = arith.addf %126, %127 : vector<8x32xf32>
    %129 = arith.addf %3, %128 : vector<8x32xf32>
    %cst_67 = arith.constant dense<0.000000e+00> : vector<8xf32>
    %130 = vector.multi_reduction <add>, %129, %cst_67 [1] : vector<8x32xf32> to vector<8xf32>
    %131 = vector.shape_cast %130 : vector<8xf32> to vector<8x1xf32>
    %cst_68 = arith.constant 3.200000e+01 : f32
    %132 = vector.broadcast %cst_68 : f32 to vector<8x1xf32>
    %133 = arith.divf %131, %132 : vector<8x1xf32>
    %134 = vector.broadcast %133 : vector<8x1xf32> to vector<8x32xf32>
    %135 = arith.subf %129, %134 : vector<8x32xf32>
    %136 = arith.mulf %135, %135 : vector<8x32xf32>
    %cst_69 = arith.constant dense<0.000000e+00> : vector<8xf32>
    %137 = vector.multi_reduction <add>, %136, %cst_69 [1] : vector<8x32xf32> to vector<8xf32>
    %138 = vector.shape_cast %137 : vector<8xf32> to vector<8x1xf32>
    %cst_70 = arith.constant 3.200000e+01 : f32
    %139 = vector.broadcast %cst_70 : f32 to vector<8x1xf32>
    %140 = arith.divf %138, %139 : vector<8x1xf32>
    %cst_71 = arith.constant 9.99999974E-6 : f32
    %141 = vector.broadcast %cst_71 : f32 to vector<8x1xf32>
    %142 = arith.addf %140, %141 : vector<8x1xf32>
    %143 = math.rsqrt %142 : vector<8x1xf32>
    %144 = vector.broadcast %133 : vector<8x1xf32> to vector<8x32xf32>
    %145 = arith.subf %129, %144 : vector<8x32xf32>
    %146 = vector.broadcast %143 : vector<8x1xf32> to vector<8x32xf32>
    %147 = arith.mulf %145, %146 : vector<8x32xf32>
    %148 = vector.broadcast %15 : vector<1x32xf32> to vector<8x32xf32>
    %149 = arith.mulf %147, %148 : vector<8x32xf32>
    %150 = vector.broadcast %17 : vector<1x32xf32> to vector<8x32xf32>
    %151 = arith.addf %149, %150 : vector<8x32xf32>
    %152 = arith.truncf %151 : vector<8x32xf32> to vector<8x32xbf16>
    %c0_72 = arith.constant 0 : index
    %c0_73 = arith.constant 0 : index
    %c0_74 = arith.constant 0 : index
    %153 = vector.load %arg6[%c0_72, %c0_73, %c0_74] : memref<1x32x2048xbf16, #tpu.memory_space<vmem>>, vector<1x32x2048xbf16>
    %154 = vector.shape_cast %153 : vector<1x32x2048xbf16> to vector<32x2048xbf16>
    %cst_75 = arith.constant dense<0.000000e+00> : vector<8x2048xf32>
    %155 = tpu.matmul %152, %154, %cst_75 {dimension_numbers = #tpu.dot_dimension_numbers<[1], [0], [0], [1], [0, 0, 1, 1], [], []>} : vector<8x32xbf16>, vector<32x2048xbf16>, vector<8x2048xf32> -> vector<8x2048xf32>
    %c0_76 = arith.constant 0 : index
    %c0_77 = arith.constant 0 : index
    %c0_78 = arith.constant 0 : index
    %156 = vector.load %arg8[%c0_76, %c0_77, %c0_78] : memref<1x1x2048xf32, #tpu.memory_space<vmem>>, vector<1x1x2048xf32>
    %157 = vector.shape_cast %156 : vector<1x1x2048xf32> to vector<1x2048xf32>
    %158 = vector.broadcast %157 : vector<1x2048xf32> to vector<8x2048xf32>
    %159 = arith.addf %155, %158 : vector<8x2048xf32>
    %cst_79 = arith.constant 0.000000e+00 : f32
    %160 = vector.broadcast %cst_79 : f32 to vector<8x2048xf32>
    %161 = arith.maximumf %159, %160 : vector<8x2048xf32>
    %162 = arith.truncf %161 : vector<8x2048xf32> to vector<8x2048xbf16>
    %c0_80 = arith.constant 0 : index
    %c0_81 = arith.constant 0 : index
    %c0_82 = arith.constant 0 : index
    %163 = vector.load %arg7[%c0_80, %c0_81, %c0_82] : memref<1x2048x32xbf16, #tpu.memory_space<vmem>>, vector<1x2048x32xbf16>
    %164 = vector.shape_cast %163 : vector<1x2048x32xbf16> to vector<2048x32xbf16>
    %cst_83 = arith.constant dense<0.000000e+00> : vector<8x32xf32>
    %165 = tpu.matmul %162, %164, %cst_83 {dimension_numbers = #tpu.dot_dimension_numbers<[1], [0], [0], [1], [0, 0, 1, 1], [], []>} : vector<8x2048xbf16>, vector<2048x32xbf16>, vector<8x32xf32> -> vector<8x32xf32>
    %166 = vector.broadcast %13 : vector<1x32xf32> to vector<8x32xf32>
    %167 = arith.addf %165, %166 : vector<8x32xf32>
    %168 = arith.addf %151, %167 : vector<8x32xf32>
    %cst_84 = arith.constant dense<0.000000e+00> : vector<8xf32>
    %169 = vector.multi_reduction <add>, %168, %cst_84 [1] : vector<8x32xf32> to vector<8xf32>
    %170 = vector.shape_cast %169 : vector<8xf32> to vector<8x1xf32>
    %cst_85 = arith.constant 3.200000e+01 : f32
    %171 = vector.broadcast %cst_85 : f32 to vector<8x1xf32>
    %172 = arith.divf %170, %171 : vector<8x1xf32>
    %173 = vector.broadcast %172 : vector<8x1xf32> to vector<8x32xf32>
    %174 = arith.subf %168, %173 : vector<8x32xf32>
    %175 = arith.mulf %174, %174 : vector<8x32xf32>
    %cst_86 = arith.constant dense<0.000000e+00> : vector<8xf32>
    %176 = vector.multi_reduction <add>, %175, %cst_86 [1] : vector<8x32xf32> to vector<8xf32>
    %177 = vector.shape_cast %176 : vector<8xf32> to vector<8x1xf32>
    %cst_87 = arith.constant 3.200000e+01 : f32
    %178 = vector.broadcast %cst_87 : f32 to vector<8x1xf32>
    %179 = arith.divf %177, %178 : vector<8x1xf32>
    %cst_88 = arith.constant 9.99999974E-6 : f32
    %180 = vector.broadcast %cst_88 : f32 to vector<8x1xf32>
    %181 = arith.addf %179, %180 : vector<8x1xf32>
    %182 = math.rsqrt %181 : vector<8x1xf32>
    %183 = vector.broadcast %172 : vector<8x1xf32> to vector<8x32xf32>
    %184 = arith.subf %168, %183 : vector<8x32xf32>
    %185 = vector.broadcast %182 : vector<8x1xf32> to vector<8x32xf32>
    %186 = arith.mulf %184, %185 : vector<8x32xf32>
    %187 = vector.broadcast %19 : vector<1x32xf32> to vector<8x32xf32>
    %188 = arith.mulf %186, %187 : vector<8x32xf32>
    %189 = vector.broadcast %21 : vector<1x32xf32> to vector<8x32xf32>
    %190 = arith.addf %188, %189 : vector<8x32xf32>
    %c0_89 = arith.constant 0 : index
    %c0_90 = arith.constant 0 : index
    %191 = vector.load %arg10[%c0_89, %c0_90] : memref<8x32xf32, #tpu.memory_space<vmem>>, vector<8x32xf32>
    tpu.vector_store %arg10[%c0_89, %c0_90], %190 {strides = array<i32>} : memref<8x32xf32, #tpu.memory_space<vmem>>, vector<8x32xf32>,
    return
  }
  func.func @transform_0(%arg0: i32) -> (i32, i32) {
    %c0_i32 = arith.constant 0 : i32
    %c0_i32_0 = arith.constant 0 : i32
    %c0_i32_1 = arith.constant 0 : i32
    return %c0_i32, %c0_i32_0 : i32, i32
  }
  func.func @transform_1(%arg0: i32) -> (i32, i32, i32) {
    %c0_i32 = arith.constant 0 : i32
    %c0_i32_0 = arith.constant 0 : i32
    %c0_i32_1 = arith.constant 0 : i32
    return %arg0, %c0_i32, %c0_i32_0 : i32, i32, i32
  }
  func.func @transform_2(%arg0: i32) -> (i32, i32, i32) {
    %c0_i32 = arith.constant 0 : i32
    %c0_i32_0 = arith.constant 0 : i32
    %c0_i32_1 = arith.constant 0 : i32
    return %arg0, %c0_i32, %c0_i32_0 : i32, i32, i32
  }
  func.func @transform_3(%arg0: i32) -> (i32, i32, i32) {
    %c0_i32 = arith.constant 0 : i32
    %c0_i32_0 = arith.constant 0 : i32
    %c0_i32_1 = arith.constant 0 : i32
    return %arg0, %c0_i32, %c0_i32_0 : i32, i32, i32
  }
  func.func @transform_4(%arg0: i32) -> (i32, i32, i32) {
    %c0_i32 = arith.constant 0 : i32
    %c0_i32_0 = arith.constant 0 : i32
    %c0_i32_1 = arith.constant 0 : i32
    return %arg0, %c0_i32, %c0_i32_0 : i32, i32, i32
  }
  func.func @transform_5(%arg0: i32) -> (i32, i32, i32) {
    %c0_i32 = arith.constant 0 : i32
    %c0_i32_0 = arith.constant 0 : i32
    %c0_i32_1 = arith.constant 0 : i32
    return %arg0, %c0_i32, %c0_i32_0 : i32, i32, i32
  }
  func.func @transform_6(%arg0: i32) -> (i32, i32, i32) {
    %c0_i32 = arith.constant 0 : i32
    %c0_i32_0 = arith.constant 0 : i32
    %c0_i32_1 = arith.constant 0 : i32
    return %arg0, %c0_i32, %c0_i32_0 : i32, i32, i32
  }
  func.func @transform_7(%arg0: i32) -> (i32, i32, i32) {
    %c0_i32 = arith.constant 0 : i32
    %c0_i32_0 = arith.constant 0 : i32
    %c0_i32_1 = arith.constant 0 : i32
    return %arg0, %c0_i32, %c0_i32_0 : i32, i32, i32
  }
  func.func @transform_8(%arg0: i32) -> (i32, i32, i32) {
    %c0_i32 = arith.constant 0 : i32
    %c0_i32_0 = arith.constant 0 : i32
    %c0_i32_1 = arith.constant 0 : i32
    return %arg0, %c0_i32, %c0_i32_0 : i32, i32, i32
  }
  func.func @transform_9(%arg0: i32) -> (i32, i32) {
    %c0_i32 = arith.constant 0 : i32
    %c0_i32_0 = arith.constant 0 : i32
    %c0_i32_1 = arith.constant 0 : i32
    return %c0_i32, %c0_i32_0 : i32, i32
  }
}

</mosaic_0001>

<bundles_post_ra>
// kernel: tpu_custom_call.1
= control target key start
LH: loop header
LB: loop body
LE: loop exit
PB: predicated region body
PF: predicated region fallthrough
CT: control target
= control target key end

     0   :  { %s4959_s0 = inlined_call_operand.vmem [shape: f32[8,32], index: 0, kind: input, shape index: {}]   ;;  %s4960_s1 = inlined_call_operand.vmem [shape: bf16[2,32,32], index: 1, kind: input, shape index: {}]   ;;  %s4961_s2 = inlined_call_operand.vmem [shape: bf16[2,32,32], index: 2, kind: input, shape index: {}]   ;;  %s4962_s3 = inlined_call_operand.vmem [shape: bf16[2,32,32], index: 3, kind: input, shape index: {}]   ;;  %s4963_s4 = inlined_call_operand.vmem [shape: bf16[2,32,32], index: 4, kind: input, shape index: {}]   ;;  %s4964_s5 = inlined_call_operand.vmem [shape: bf16[2,32,2048], index: 5, kind: input, shape index: {}]   ;;  %s4965_s6 = inlined_call_operand.vmem [shape: bf16[2,2048,32], index: 6, kind: input, shape index: {}]   ;;  %s4966_s7 = inlined_call_operand.vmem [shape: f32[2,1,2048], index: 7, kind: input, shape index: {}]   ;;  %s4967_s8 = inlined_call_operand.vmem [shape: f32[2,16,32], index: 8, kind: input, shape index: {}]   ;;  %s4968_s9 = inlined_call_operand.hbm [shape: f32[8,32], index: 9, kind: output, shape index: {}]  }
   0x1   :  { %4969 = sst [smem:[#allocation5_spill]] %s4960_s1 }
   0x2   :  { %14 = vsyncpa [#allocation3], 0  ;;  %s4486_s30 = smov 0  }
   0x3 LB: > { %s4492_s10 = sadd.s32 4294967295, %s4427_s30   ;;  %p3691_p0 = scmp.ge.s32.totalorder %s4427_s30, 1  ;;  %s4427_s30 = sphi %s4486_s30, %s20_s30  }
   0x4   : > { %p352_p1 = scmp.lt.s32.totalorder %s4427_s30, 3 }
   0x6   : > { %p353_p2 = pnand %p3691_p0, %p352_p1 }
   0x7   : > { %p417_p3 = scmp.lt.s32.totalorder (!%p353_p2), %s4492_s10, 1  ;;  %s4970_s1 = sld [smem:[#allocation5_spill]] (!%p353_p2) }
   0x8   : > { %356 = sbr.rel (%p353_p2) target bundleno = 3596 (0xe0c), region = 56  ;;  %p3707_p4 = scmp.ne.s32.totalorder (!%p353_p2), %s4492_s10, 0 }
   0xd   : > { %s418_s11 = scalar_select %p417_p3, %s4492_s10, 1 }
   0xf   : > { %s3914_s12 = sshll.u32 %s418_s11, 4  ;;  %s3918_s13 = sshll.u32 %s418_s11, 8 }
  0x10   : > { %s421_s16 = scalar_lea.vmem %s4970_s1, %s3914_s12  ;;  %s426_s19 = scalar_lea.vmem %s4961_s2, %s3914_s12 }
  0x11   : > { %s4507_s22 = scalar_lea.vmem %s4962_s3, %s3914_s12  ;;  %s4512_s25 = scalar_lea.vmem %s4963_s4, %s3914_s12 }
  0x12   : > { %s4517_s28 = scalar_lea.vmem %s4964_s5, %s3918_s13  ;;  %s3919_s29 = sshll.u32 %s418_s11, 10 }
  0x13   : > { %s4522_s17 = scalar_lea.vmem %s4965_s6, %s3919_s29  ;;  %s4527_s21 = scalar_lea.vmem %s4966_s7, %s3914_s12 }
  0x14   : > { %s4532_s24 = scalar_lea.vmem %s4967_s8, %s3914_s12  ;;  %460 = sbr.rel (%p3707_p4) target bundleno = 27 (0x1b), region = 60 }
  0x19   : > { %v461_v0 = vld [vmem:[%s4959_s0] sm:$0xff]  ;;  %vm462_vm0 = vcmask 261120  }
  0x1a   : > { %463 = vst.msk [vmem:[#allocation2] sm:$0xff] %vm462_vm0, %v461_v0 }
  0x1b PF: > { %v4239_v1 = vld [vmem:[%s426_s19 + $0x8] sm:$0xff]   ;;  %v4429_v2 = vmov 0.0   ;;  %v4241_v4 = vld [vmem:[%s426_s19] sm:$0xff]   ;;  %vm4430_vm1 = vmmov 0   ;;  %vm495_vm2 = vcmask 261120   ;;  %vm659_vm3 = vcmask 64512  }
  0x1c   : > { %4138 = vmatprep.subr.bf16.mxu1 %v4429_v2  ;;  %4130 = vmatprep.subr.bf16.mxu0 %v4429_v2  ;;  %v4240_v3 = vld [vmem:[%s421_s16 + $0x8] sm:$0xff]   ;;  %v4242_v5 = vld [vmem:[%s421_s16] sm:$0xff]   ;;  %s4431_s1 = smov 120   ;;  %s4432_s12 = smov 112   ;;  %vm995_vm4 = vcmask 1043456  }
  0x1d   : > { %4139 = vmatpush3.bf16.msra.mxu1 %v4239_v1  ;;  %4142 = vmatprep.mubr.msk.bf16.mxu1 %vm4430_vm1, %v4429_v2  ;;  %v4243_v8 = vld [vmem:[%s4507_s22 + $0x8] sm:$0xff]   ;;  %v4244_v9 = vld [vmem:[%s4507_s22] sm:$0xff]   ;;  %s4433_s16 = smov 104   ;;  %s4435_s19 = smov [#allocation2]  }
  0x1e   : > { %4131 = vmatpush3.bf16.msra.mxu0 %v4240_v3  ;;  %4140 = vmatprep.subr.bf16.mxu1 %v4429_v2  ;;  %v3712_v10 = vld [vmem:[%s4532_s24 + $0x1] ss:$0 sm:$0xff]  ;;  %v3708_v11 = vld [vmem:[%s4532_s24] ss:$0 sm:$0xff]  ;;  %v3716_v22 = vld [vmem:[%s4532_s24 + $0x2] ss:$0 sm:$0xff] }
  0x1f   : > { %4132 = vmatprep.subr.bf16.mxu0 %v4429_v2  ;;  %4134 = vmatprep.mubr.msk.bf16.mxu0 %vm4430_vm1, %v4429_v2  ;;  %v990_v51 = vld [vmem:[%s4512_s25 + $0x4] sm:$0xf]  ;;  %v821_v55 = vld [vmem:[%s4512_s25] sm:$0xf]  ;;  %s3565_s22 = sshll.u32 %s4435_s19, 4  ;;  %p4222_p5 = scmp.eq.s32.totalorder %s4492_s10, 1  ;;  %s3566_s22 = int_to_ptr.vmem [resolvable:$true] %s3565_s22 }
  0x20   : > { %v997_v52 = vsel %vm995_vm4, %v990_v51, 0  ;;  %v1043_v58 = vsel %vm995_vm4, %v821_v55, 0  ;;  %p4400_p9 = scmp.lt.s32.totalorder %s3566_s22, %s3566_s22 }
  0x21   : > { %v4544_v6 = vld [vmem:[#allocation2] sm:$0xff]  ;;  %4141 = vmatpush3.bf16.msra.mxu1 %v4241_v4 }
  0x22   : > { %v474_v7 = vpack.c.bf16 %v4544_v6, %v4544_v6  ;;  %4133 = vmatpush3.bf16.msra.mxu0 %v4242_v5  ;;  %4154 = vmatprep.subr.mxu1 %v4429_v2 }
  0x23   : > { %4146 = vmatprep.subr.bf16.mxu0 %v4429_v2 }
  0x24   : > { %4143 = vmatmul.mubr.msk.bf16.vlgmr.msra.gmra.mxu1 %vm495_vm2, %v474_v7 }
  0x25   : > { %4135 = vmatmul.mubr.msk.bf16.vlgmr.msra.gmra.mxu0 %vm495_vm2, %v474_v7  ;;  %4156 = vmatprep.mubr.msk.f32.mxu1 %vm4430_vm1, %v4429_v2 }
  0x26   : > { %4150 = vmatprep.mubr.msk.bf16.mxu0 %vm4430_vm1, %v4429_v2  ;;  %4147 = vmatpush3.bf16.msra.mxu0 %v4243_v8 }
  0x27   : > { %4148 = vmatprep.subr.bf16.mxu0 %v4429_v2 }
  0x2a   : > { %4149 = vmatpush3.bf16.msra.mxu0 %v4244_v9 }
  0x2b   : > { %4164 = vmatprep.subr.mxu0 %v4429_v2 }
  0x2d   : > { %4151 = vmatmul.mubr.msk.bf16.vlgmr.msra.gmra.mxu0 %vm495_vm2, %v474_v7 }
  0x2e   : > { %4166 = vmatprep.mubr.msk.f32.mxu0 %vm4430_vm1, %v4429_v2 }
  0xe4   : > { %v593_v12 = vpop.f32.mrf.mxu1 }
  0xe5   : > { %v4567_v13 = vadd.f32 %v3712_v10, %v593_v12  ;;  %v533_v14 = vpop.f32.mrf.mxu0 }
  0xe6   : > { %v4569_v15 = vadd.f32 %v3708_v11, %v533_v14  ;;  %v4144_v16 = vpop.f32.mrf.mxu1 }
  0xe7   : > { %825 = vrot.lane.b32.xlu0 %v4567_v13, %s4431_s1  ;;  %4155 = vmatpush3.xpose.msk.msra.mxu1 %vm659_vm3, %v4567_v13  ;;  %v4136_v17 = vpop.f32.mrf.mxu0 }
  0xe8   : > { %v596_v18 = vpop.f32.mrf.mxu1  ;;  %4159 = vmatprep.subr.mxu1 %v4429_v2 }
  0xe9   : > { %v536_v19 = vpop.f32.mrf.mxu0 }
  0xea   : > { %v4145_v20 = vpop.f32.mrf.mxu1  ;;  %4157 = vmatmul.mubr.msk.f32.vlgmr.msra.gmra.mxu1 %vm659_vm3, %v4569_v15 }
  0xeb   : > { %823 = vrot.lane.b32.xlu0 %v4569_v15, %s4431_s1  ;;  %v4137_v21 = vpop.f32.mrf.mxu0  ;;  %4161 = vmatprep.mubr.msk.f32.mxu1 %vm4430_vm1, %v4429_v2 }
  0xed   : > { %v653_v23 = vpop.f32.mrf.mxu0 }
  0xee   : > { %v4583_v24 = vadd.f32 %v3716_v22, %v653_v23 }
  0xef   : > { %v4152_v25 = vpop.f32.mrf.mxu0 }
  0xf0   : > { %4160 = vmatpush3.msra.mxu1 %v4583_v24 }
  0xf1   : > { %v656_v26 = vpop.f32.mrf.mxu0  ;;  %4169 = vmatprep.subr.mxu1 %v4429_v2 }
  0xf3   : > { %v4153_v27 = vpop.f32.mrf.mxu0 }
 0x159   : > { %v826_v28 = vpop.permute.xlu0 %825 }
 0x15a   : > { %4165 = vmatpush3.xpose.msk.msra.mxu0 %vm659_vm3, %v826_v28 }
 0x15b   : > { %4174 = vmatprep.subr.bf16.mxu0 %v4429_v2 }
 0x15d   : > { %v824_v29 = vpop.permute.xlu0 %823 }
 0x15e   : > { %4167 = vmatmul.mubr.msk.f32.vlgmr.msra.gmra.mxu0 %vm659_vm3, %v824_v29 }
 0x15f   : > { %4176 = vmatprep.mubr.msk.bf16.mxu0 %vm4430_vm1, %v4429_v2  ;;  %4175 = vmatpush3.bf16.msra.mxu0 %v997_v52 }
 0x160   : > { %4186 = vmatprep.subr.mxu0 %v4429_v2 }
 0x1aa   : > { %v732_v30 = vpop.f32.mrf.mxu1 }
 0x1ab   : > { %v736_v31 = vmul.f32 0.35355338, %v732_v30 }
 0x1ac   : > { %v4158_v32 = vpop.f32.mrf.mxu1 }
 0x1ad   : > { %v737_v33 = vsel %vm659_vm3, %v736_v31, -inf }
 0x1ae   : > { %738 = vmax.xlane.f32.xlu1 %v737_v33 }
 0x21e   : > { %v897_v34 = vpop.f32.mrf.mxu0 }
 0x21f   : > { %v901_v35 = vmul.f32 0.35355338, %v897_v34 }
 0x220   : > { %v4168_v36 = vpop.f32.mrf.mxu0 }
 0x221   : > { %v902_v37 = vsel %vm659_vm3, %v901_v35, -inf }
 0x222   : > { %903 = vmax.xlane.f32.xlu1 %v902_v37 }
 0x237   : > { %v739_v38 = vpop.xlane.xlu1 %738 }
 0x238   : > { %v740_v39 = vsub.f32 %v736_v31, %v739_v38 }
 0x23a   : > { %v741_v40 = vmul.f32 1.442695, %v740_v39 }
 0x23c   : > { %4373 = vpow2.f32 %v741_v40 }
 0x249   : > { %v4374_v41 = vpop.eup %4373 }
 0x24a   : > { %v743_v42 = vsel %vm659_vm3, %v4374_v41, 0.0 }
 0x24b   : > { %744 = vadd.xlane.f32.xlu0 %v743_v42 }
 0x261   : > { %1175 = vrot.lane.b32.xlu0 %v4583_v24, %s4432_s12 }
 0x2ab   : > { %v904_v43 = vpop.xlane.xlu1 %903 }
 0x2ac   : > { %v905_v44 = vsub.f32 %v901_v35, %v904_v43  ;;  %v1466_v43 = vld [vmem:[%s4512_s25 + $0xc] sm:$0xf] }
 0x2ae   : > { %v906_v45 = vmul.f32 1.442695, %v905_v44  ;;  %v1472_v44 = vsel %vm995_vm4, %v1466_v43, 0  ;;  %v1549_v43 = vld [vmem:[%s4517_s28 + $0x18] sm:$0xff] }
 0x2b0   : > { %4375 = vpow2.f32 %v906_v45 }
 0x2bd   : > { %v4376_v46 = vpop.eup %4375 }
 0x2be   : > { %v908_v47 = vsel %vm659_vm3, %v4376_v46, 0.0 }
 0x2bf   : > { %909 = vadd.xlane.f32.xlu1 %v908_v47 }
 0x2d0   : > { %914 = vrot.lane.b32.xlu1 %v4583_v24, %s4431_s1 }
 0x2d4   : > { %v745_v48 = vpop.xlane.xlu0 %744  ;;  %1087 = vrot.lane.b32.xlu1 %v4567_v13, %s4432_s12 }
 0x2d5   : > { %4377 = vrcp.f32 %v745_v48 }
 0x2d8   : > { %1085 = vrot.lane.b32.xlu1 %v4569_v15, %s4432_s12  ;;  %v1176_v62 = vpop.permute.xlu0 %1175 }
 0x2e2   : > { %v4378_v49 = vpop.eup %4377 }
 0x2e3   : > { %v747_v50 = vmul.f32 %v4378_v49, %v4374_v41 }
 0x2e5   : > { %4162 = vmatmul.mubr.msk.f32.vlgmr.msra.gmra.mxu1 %vm659_vm3, %v747_v50 }
 0x2e6   : > { %4171 = vmatprep.mubr.msk.f32.mxu1 %vm4430_vm1, %v4429_v2 }
 0x348   : > { %v910_v53 = vpop.xlane.xlu1 %909 }
 0x349   : > { %4379 = vrcp.f32 %v910_v53 }
 0x34c   : > { %v915_v54 = vpop.permute.xlu1 %914 }
 0x34d   : > { %4170 = vmatpush3.msra.mxu1 %v915_v54 }
 0x34e   : > { %4180 = vmatprep.subr.bf16.mxu1 %v4429_v2 }
 0x350   : > { %v1088_v3 = vpop.permute.xlu1 %1087 }
 0x354   : > { %v1086_v4 = vpop.permute.xlu1 %1085 }
 0x356   : > { %v4380_v56 = vpop.eup %4379 }
 0x357   : > { %v912_v57 = vmul.f32 %v4380_v56, %v4376_v46  ;;  %v3736_v56 = vld [vmem:[%s4532_s24 + $0x3] ss:$0 sm:$0xff] }
 0x359   : > { %4172 = vmatmul.mubr.msk.f32.vlgmr.msra.gmra.mxu1 %vm659_vm3, %v912_v57 }
 0x35a   : > { %4181 = vmatpush3.bf16.msra.mxu1 %v1043_v58  ;;  %4182 = vmatprep.mubr.msk.bf16.mxu1 %vm4430_vm1, %v4429_v2 }
 0x35b   : > { %4191 = vmatprep.subr.mxu1 %v4429_v2 }
 0x3a5   : > { %v817_v59 = vpop.f32.mrf.mxu1 }
 0x3a6   : > { %v822_v60 = vpack.c.bf16 %v817_v59, %v817_v59 }
 0x3a7   : > { %v4163_v61 = vpop.f32.mrf.mxu1 }
 0x3a8   : > { %4183 = vmatmul.mubr.msk.bf16.vlgmr.msra.gmra.mxu1 %vm659_vm3, %v822_v60 }
 0x3a9   : > { %4192 = vmatpush3.msra.mxu1 %v1176_v62  ;;  %4193 = vmatprep.mubr.msk.f32.mxu1 %vm4430_vm1, %v4429_v2 }
 0x3aa   : > { %4202 = vmatprep.subr.mxu1 %v4429_v2 }
 0x419   : > { %v986_v63 = vpop.f32.mrf.mxu1 }
 0x41a   : > { %v991_v0 = vpack.c.bf16 %v986_v63, %v986_v63 }
 0x41b   : > { %v4173_v1 = vpop.f32.mrf.mxu1 }
 0x41c   : > { %4177 = vmatmul.mubr.msk.bf16.vlgmr.msra.gmra.mxu0 %vm659_vm3, %v991_v0 }
 0x41d   : > { %4187 = vmatpush3.xpose.msk.msra.mxu0 %vm659_vm3, %v1088_v3  ;;  %4188 = vmatprep.mubr.msk.f32.mxu0 %vm4430_vm1, %v4429_v2 }
 0x41e   : > { %4196 = vmatprep.subr.bf16.mxu0 %v4429_v2 }
 0x424   : > { %4189 = vmatmul.mubr.msk.f32.vlgmr.msra.gmra.mxu0 %vm659_vm3, %v1086_v4 }
 0x425   : > { %4198 = vmatprep.mubr.msk.bf16.mxu0 %vm4430_vm1, %v4429_v2 }
 0x468   : > { %v1079_v5 = vpop.f32.mrf.mxu1 }
 0x46a   : > { %v4184_v7 = vpop.f32.mrf.mxu1 }
 0x46c   : > { %v1082_v8 = vpop.f32.mrf.mxu1 }
 0x46d   : > { %v1562_v8 = vld [vmem:[%s4517_s28 + $0x80] sm:$0xff] }
 0x46e   : > { %v4185_v9 = vpop.f32.mrf.mxu1 }
 0x46f   : > { %v1570_v9 = vld [vmem:[%s4517_s28 + $0xc0] sm:$0xff] }
 0x4dc   : > { %v1033_v10 = vpop.f32.mrf.mxu0 }
 0x4de   : > { %v4178_v11 = vpop.f32.mrf.mxu0 }
 0x4df   : > { %v3756_v11 = vcombine.high %v1562_v8, %v1570_v9 }
 0x4e0   : > { %v1036_v12 = vpop.f32.mrf.mxu0 }
 0x4e1   : > { %v3755_v12 = vcombine.low %v1562_v8, %v1570_v9  ;;  %v1552_v9 = vld [vmem:[%s4517_s28 + $0x30] sm:$0xff] }
 0x4e2   : > { %v4179_v14 = vpop.f32.mrf.mxu0 }
 0x4e4   : > { %v1159_v16 = vpop.f32.mrf.mxu0 }
 0x4e5   : > { %v1163_v17 = vmul.f32 0.35355338, %v1159_v16 }
 0x4e6   : > { %v4190_v18 = vpop.f32.mrf.mxu0 }
 0x4e7   : > { %v1164_v19 = vsel %vm659_vm3, %v1163_v17, -inf  ;;  %v1554_v18 = vld [vmem:[%s4517_s28 + $0x40] sm:$0xff] }
 0x4e8   : > { %1165 = vmax.xlane.f32.xlu1 %v1164_v19  ;;  %v1547_v19 = vld [vmem:[%s4517_s28 + $0x8] sm:$0xff] }
 0x571   : > { %v1166_v20 = vpop.xlane.xlu1 %1165 }
 0x572   : > { %v1167_v21 = vsub.f32 %v1163_v17, %v1166_v20  ;;  %v1546_v17 = vld [vmem:[%s4517_s28] sm:$0xff] }
 0x573   : > { %v3740_v20 = vcombine.high %v1546_v17, %v1554_v18 }
 0x574   : > { %v1168_v22 = vmul.f32 1.442695, %v1167_v21  ;;  %v1555_v21 = vld [vmem:[%s4517_s28 + $0x48] sm:$0xff] }
 0x576   : > { %4381 = vpow2.f32 %v1168_v22  ;;  %v3739_v22 = vcombine.low %v1546_v17, %v1554_v18 }
 0x583   : > { %v4382_v23 = vpop.eup %4381 }
 0x584   : > { %v1170_v25 = vsel %vm659_vm3, %v4382_v23, 0.0 }
 0x585   : > { %1171 = vadd.xlane.f32.xlu0 %v1170_v25  ;;  %v3742_v25 = vcombine.high %v1547_v19, %v1555_v21 }
 0x59b   : > { %1302 = vrot.lane.b32.xlu0 %v4567_v13, %s4433_s16  ;;  %v1251_v13 = vld [vmem:[%s4512_s25 + $0x8] sm:$0xf]  ;;  %s4393_s25 = scalar_lea.vmem %s3566_s22, 128 }
 0x59c   : > { %p4394_p6 = scmp.ne.s32.totalorder %s3566_s22, %s4393_s25  ;;  %p4401_p10 = scmp.lt.s32.totalorder %s4393_s25, %s4393_s25 }
 0x59e   : > { %p4395_p7 = pnand %p4394_p6, %p4222_p5  ;;  %p4402_p11 = por %p4401_p10, %p4400_p9 }
 0x59f   : > { %1300 = vrot.lane.b32.xlu0 %v4569_v15, %s4433_s16  ;;  %v1257_v15 = vsel %vm995_vm4, %v1251_v13, 0  ;;  %v1573_v13 = vld [vmem:[%s4517_s28 + $0xd8] sm:$0xff] }
 0x5a0   : > { %4197 = vmatpush3.bf16.msra.mxu0 %v1257_v15  ;;  %p4396_p8 = pneg %p4395_p7 }
 0x5a1   : > { %4212 = vmatprep.subr.bf16.mxu0 %v4429_v2 }
 0x5a2   : > { %p4403_p12 = pnand %p4402_p11, %p4396_p8 }
 0x60e   : > { %v1172_v26 = vpop.xlane.xlu0 %1171 }
 0x60f   : > { %4383 = vrcp.f32 %v1172_v26  ;;  %v1564_v26 = vld [vmem:[%s4517_s28 + $0x90] sm:$0xff] }
 0x612   : > { %v1303_v28 = vpop.permute.xlu0 %1302 }
 0x616   : > { %v1301_v30 = vpop.permute.xlu0 %1300 }
 0x61c   : > { %v4384_v27 = vpop.eup %4383 }
 0x61d   : > { %v1174_v29 = vmul.f32 %v4384_v27, %v4382_v23  ;;  %v3741_v23 = vcombine.low %v1547_v19, %v1555_v21  ;;  %v1572_v27 = vld [vmem:[%s4517_s28 + $0xd0] sm:$0xff]  ;;  %v4246_v21 = vld [vmem:[%s4522_s17 + $0xf8] sm:$0xff]  }
 0x61e   : > { %v3759_v15 = vcombine.low %v1564_v26, %v1572_v27 }
 0x61f   : > { %4194 = vmatmul.mubr.msk.f32.vlgmr.msra.gmra.mxu1 %vm659_vm3, %v1174_v29  ;;  %v4434_v29 = vmov 0  }
 0x620   : > { %4203 = vmatpush3.xpose.msk.msra.mxu1 %vm659_vm3, %v1303_v28  ;;  %4204 = vmatprep.mubr.msk.f32.mxu1 %vm4430_vm1, %v4429_v2  ;;  %v1565_v28 = vld [vmem:[%s4517_s28 + $0x98] sm:$0xff] }
 0x621   : > { %4207 = vmatprep.subr.mxu1 %v4429_v2 }
 0x623   : > { %4205 = vmatmul.mubr.msk.f32.vlgmr.msra.gmra.mxu1 %vm659_vm3, %v1301_v30  ;;  %v3760_v30 = vcombine.high %v1564_v26, %v1572_v27  ;;  %v4250_v26 = vld [vmem:[%s4522_s17 + $0xf0] sm:$0xff]  }
 0x624   : > { %4209 = vmatprep.mubr.msk.f32.mxu1 %vm4430_vm1, %v4429_v2  ;;  %v4251_v27 = vld [vmem:[%s4522_s17 + $0x30] sm:$0xff]  }
 0x6df   : > { %v1247_v31 = vpop.f32.mrf.mxu1 }
 0x6e0   : > { %v1252_v32 = vpack.c.bf16 %v1247_v31, %v1247_v31  ;;  %v3761_v31 = vcombine.low %v1565_v28, %v1573_v13 }
 0x6e1   : > { %v4195_v33 = vpop.f32.mrf.mxu1 }
 0x6e2   : > { %4199 = vmatmul.mubr.msk.bf16.vlgmr.msra.gmra.mxu0 %vm659_vm3, %v1252_v32  ;;  %v3762_v32 = vcombine.high %v1565_v28, %v1573_v13  ;;  %v4252_v28 = vld [vmem:[%s4522_s17 + $0xb0] sm:$0xff]   ;;  %v4255_v13 = vld [vmem:[%s4522_s17 + $0x28] sm:$0xff]  }
 0x6e3   : > { %v1374_v34 = vpop.f32.mrf.mxu1  ;;  %4214 = vmatprep.mubr.msk.bf16.mxu0 %vm4430_vm1, %v4429_v2  ;;  %4213 = vmatpush3.bf16.msra.mxu0 %v1472_v44  ;;  %v1080_v2 = vadd.f32 %v1079_v5, %v1033_v10  ;;  %v1563_v10 = vld [vmem:[%s4517_s28 + $0x88] sm:$0xff]  ;;  %v1557_v44 = vld [vmem:[%s4517_s28 + $0x58] sm:$0xff] }
 0x6e4   : > { %v1378_v35 = vmul.f32 0.35355338, %v1374_v34 }
 0x6e5   : > { %v4206_v36 = vpop.f32.mrf.mxu1 }
 0x6e6   : > { %v1379_v37 = vsel %vm659_vm3, %v1378_v35, -inf }
 0x6e7   : > { %1380 = vmax.xlane.f32.xlu0 %v1379_v37  ;;  %v3737_v37 = vld [vmem:[%s4532_s24 + $0x5] ss:$0 sm:$0xff] }
 0x770   : > { %v1381_v38 = vpop.xlane.xlu0 %1380 }
 0x771   : > { %v1382_v39 = vsub.f32 %v1378_v35, %v1381_v38 }
 0x773   : > { %v1383_v40 = vmul.f32 1.442695, %v1382_v39  ;;  %v3738_v39 = vld [vmem:[%s4532_s24 + $0x6] ss:$0 sm:$0xff] }
 0x775   : > { %4385 = vpow2.f32 %v1383_v40 }
 0x782   : > { %v4386_v41 = vpop.eup %4385 }
 0x783   : > { %v1385_v42 = vsel %vm659_vm3, %v4386_v41, 0.0 }
 0x784   : > { %1386 = vadd.xlane.f32.xlu1 %v1385_v42  ;;  %v1556_v42 = vld [vmem:[%s4517_s28 + $0x50] sm:$0xff] }
 0x795   : > { %1390 = vrot.lane.b32.xlu1 %v4583_v24, %s4433_s16 }
 0x7a2   : > { %v1293_v45 = vpop.f32.mrf.mxu0 }
 0x7a3   : > { %v1299_v46 = vadd.f32 %v1293_v45, %v1080_v2 }
 0x7a4   : > { %v4200_v47 = vpop.f32.mrf.mxu0 }
 0x7a5   : > { %v3746_v47 = vcombine.high %v1549_v43, %v1557_v44 }
 0x7a6   : > { %v1296_v48 = vpop.f32.mrf.mxu0 }
 0x7a7   : > { %v1566_v48 = vld [vmem:[%s4517_s28 + $0xa0] sm:$0xff] }
 0x7a8   : > { %v4201_v49 = vpop.f32.mrf.mxu0 }
 0x7a9   : > { %v1574_v49 = vld [vmem:[%s4517_s28 + $0xe0] sm:$0xff] }
 0x80d   : > { %v1387_v50 = vpop.xlane.xlu1 %1386 }
 0x80e   : > { %4387 = vrcp.f32 %v1387_v50  ;;  %v1567_v50 = vld [vmem:[%s4517_s28 + $0xa8] sm:$0xff] }
 0x811   : > { %v1391_v51 = vpop.permute.xlu1 %1390 }
 0x812   : > { %4208 = vmatpush3.msra.mxu1 %v1391_v51  ;;  %v1575_v51 = vld [vmem:[%s4517_s28 + $0xe8] sm:$0xff] }
 0x813   : > { %1837 = vmatprep.subr.bf16.mxu1 %v3756_v11  ;;  %v1553_v11 = vld [vmem:[%s4517_s28 + $0x38] sm:$0xff] }
 0x81b   : > { %v4388_v52 = vpop.eup %4387 }
 0x81c   : > { %v1389_v53 = vmul.f32 %v4388_v52, %v4386_v41  ;;  %v1548_v41 = vld [vmem:[%s4517_s28 + $0x10] sm:$0xff] }
 0x81d   : > { %v3743_v52 = vcombine.low %v1548_v41, %v1556_v42 }
 0x81e   : > { %4210 = vmatmul.mubr.msk.f32.vlgmr.msra.gmra.mxu1 %vm659_vm3, %v1389_v53  ;;  %v3745_v53 = vcombine.low %v1549_v43, %v1557_v44  ;;  %v4269_v43 = vld [vmem:[%s4522_s17 + $0x48] sm:$0xff]  }
 0x81f   : > { %1838 = vmatpush1.bf16.msra.mxu1 %v3755_v12  ;;  %1857 = vmatprep.mubr.bf16.mxu1 %v4434_v29  ;;  %v4270_v44 = vld [vmem:[%s4522_s17 + $0xc8] sm:$0xff]  }
 0x820   : > { %1839 = vmatprep.subr.bf16.mxu1 %v3740_v20  ;;  %v4245_v20 = vld [vmem:[%s4522_s17 + $0x78] sm:$0xff]  }
 0x823   : > { %1840 = vmatpush1.bf16.msra.mxu1 %v3739_v22  ;;  %v4247_v22 = vld [vmem:[%s4522_s17 + $0x38] sm:$0xff]  }
 0x824   : > { %1919 = vmatprep.subr.bf16.mxu1 %v3760_v30  ;;  %v4254_v30 = vld [vmem:[%s4522_s17 + $0xe8] sm:$0xff]  }
 0x8de   : > { %v1462_v24 = vpop.f32.mrf.mxu1 }
 0x8df   : > { %v1467_v54 = vpack.c.bf16 %v1462_v24, %v1462_v24  ;;  %v3764_v24 = vcombine.high %v1566_v48, %v1574_v49 }
 0x8e0   : > { %v4211_v55 = vpop.f32.mrf.mxu1 }
 0x8e1   : > { %4215 = vmatmul.mubr.msk.bf16.vlgmr.msra.gmra.mxu0 %vm659_vm3, %v1467_v54  ;;  %v3766_v54 = vcombine.high %v1567_v50, %v1575_v51  ;;  %v1550_v55 = vld [vmem:[%s4517_s28 + $0x20] sm:$0xff] }
 0x8e2   : > { %1898 = vmatprep.mubr.bf16.mxu0 %v4434_v29 }
 0x9a1   : > { %v1508_v57 = vpop.f32.mrf.mxu0 }
 0x9a2   : > { %v1514_v58 = vadd.f32 %v1508_v57, %v1299_v46  ;;  %v3744_v46 = vcombine.high %v1548_v41, %v1556_v42  ;;  %v1551_v57 = vld [vmem:[%s4517_s28 + $0x28] sm:$0xff]  ;;  %v4267_v41 = vld [vmem:[%s4522_s17 + $0x10] sm:$0xff]  }
 0x9a3   : > { %v4216_v59 = vpop.f32.mrf.mxu0  ;;  %v4268_v42 = vld [vmem:[%s4522_s17 + $0x90] sm:$0xff]  }
 0x9a4   : > { %v1519_v60 = vadd.f32 %v3736_v56, %v1514_v58  ;;  %v1558_v56 = vld [vmem:[%s4517_s28 + $0x60] sm:$0xff]  ;;  %v1559_v58 = vld [vmem:[%s4517_s28 + $0x68] sm:$0xff]  ;;  %v3763_v59 = vcombine.low %v1566_v48, %v1574_v49 }
 0x9a5   : > { %v1511_v61 = vpop.f32.mrf.mxu0  ;;  %v4274_v48 = vld [vmem:[%s4522_s17 + $0xc0] sm:$0xff]  }
 0x9a6   : > { %v1520_v62 = vadd.f32 %v1519_v60, %v4544_v6  ;;  %v1571_v6 = vld [vmem:[%s4517_s28 + $0xc8] sm:$0xff]  ;;  %v3765_v60 = vcombine.low %v1567_v50, %v1575_v51  ;;  %v3748_v61 = vcombine.high %v1550_v55, %v1558_v56  ;;  %v4275_v49 = vld [vmem:[%s4522_s17] sm:$0xff]   ;;  %v4277_v51 = vld [vmem:[%s4522_s17 + $0x178] sm:$0xff]  }
 0x9a7   : > { %v4217_v63 = vpop.f32.mrf.mxu0  ;;  %v3757_v14 = vcombine.low %v1563_v10, %v1571_v6  ;;  %v3758_v16 = vcombine.high %v1563_v10, %v1571_v6  ;;  %v1560_v10 = vld [vmem:[%s4517_s28 + $0x70] sm:$0xff]  ;;  %v1561_v6 = vld [vmem:[%s4517_s28 + $0x78] sm:$0xff]  ;;  %v4276_v50 = vld [vmem:[%s4522_s17 + $0x80] sm:$0xff]  }
 0x9a8   : > { %v1521_v0 = vsel %vm495_vm2, %v1520_v62, 0.0  ;;  %v1568_v63 = vld [vmem:[%s4517_s28 + $0xb0] sm:$0xff]  ;;  %v3754_v17 = vcombine.high %v1553_v11, %v1561_v6  ;;  %v3751_v18 = vcombine.low %v1552_v9, %v1560_v10  ;;  %v3753_v19 = vcombine.low %v1553_v11, %v1561_v6 }
 0x9a9   : > { %1522 = vadd.xlane.f32.xlu1 %v1521_v0  ;;  %1878 = vmatprep.subr.bf16.mxu0 %v3758_v16  ;;  %v1576_v0 = vld [vmem:[%s4517_s28 + $0xf0] sm:$0xff]  ;;  %v3752_v16 = vcombine.high %v1552_v9, %v1560_v10 }
 0x9aa   : > { %1879 = vmatpush1.bf16.msra.mxu0 %v3757_v14  ;;  %v3767_v12 = vcombine.low %v1568_v63, %v1576_v0 }
 0x9ab   : > { %1880 = vmatprep.subr.bf16.mxu0 %v3742_v25  ;;  %v4249_v25 = vld [vmem:[%s4522_s17 + $0x70] sm:$0xff]  }
 0x9ae   : > { %1881 = vmatpush1.bf16.msra.mxu0 %v3741_v23  ;;  %v4248_v23 = vld [vmem:[%s4522_s17 + $0xb8] sm:$0xff]  }
 0x9af   : > { %1960 = vmatprep.subr.bf16.mxu0 %v3762_v32  ;;  %v4258_v32 = vld [vmem:[%s4522_s17 + $0xe0] sm:$0xff]  }
 0xa32   : > { %v1523_v1 = vpop.xlane.xlu1 %1522 }
 0xa33   : > { %v1525_v3 = vmul.f32 0.03125, %v1523_v1  ;;  %v1569_v1 = vld [vmem:[%s4517_s28 + $0xb8] sm:$0xff] }
 0xa35   : > { %v1526_v4 = vsub.f32 %v1520_v62, %v1525_v3  ;;  %v3750_v62 = vcombine.high %v1551_v57, %v1559_v58  ;;  %v1577_v3 = vld [vmem:[%s4517_s28 + $0xf8] sm:$0xff] }
 0xa36   : > { %v3770_v8 = vcombine.high %v1569_v1, %v1577_v3  ;;  %v3769_v14 = vcombine.low %v1569_v1, %v1577_v3 }
 0xa37   : > { %v1527_v5 = vmul.f32 %v1526_v4, %v1526_v4 }
 0xa39   : > { %v1528_v7 = vsel %vm495_vm2, %v1527_v5, 0.0  ;;  %v3749_v5 = vcombine.low %v1551_v57, %v1559_v58 }
 0xa3a   : > { %1529 = vadd.xlane.f32.xlu0 %v1528_v7  ;;  %v3768_v7 = vcombine.high %v1568_v63, %v1576_v0 }
 0xac3   : > { %v1530_v33 = vpop.xlane.xlu0 %1529 }
 0xac4   : > { %v1531_v34 = vmul.f32 0.03125, %v1530_v33  ;;  %v4259_v33 = vld [vmem:[%s4522_s17 + $0x20] sm:$0xff]  }
 0xac6   : > { %v1532_v35 = vadd.f32 1e-05, %v1531_v34  ;;  %v4260_v34 = vld [vmem:[%s4522_s17 + $0xa0] sm:$0xff]  }
 0xac8   : > { %4389 = vrsqrt.f32 %v1532_v35  ;;  %v4261_v35 = vld [vmem:[%s4522_s17 + $0x58] sm:$0xff]  }
 0xad5   : > { %v4390_v36 = vpop.eup %4389 }
 0xad6   : > { %v1534_v38 = vmul.f32 %v4390_v36, %v1526_v4  ;;  %v3747_v4 = vcombine.low %v1550_v55, %v1558_v56  ;;  %v4262_v36 = vld [vmem:[%s4522_s17 + $0xd8] sm:$0xff]   ;;  %v4760_v55 = vld [vmem:[%s4527_s21 + $0x8] sm:$0xff] }
 0xad8   : > { %v1539_v40 = vmul.f32 %v3737_v37, %v1534_v38  ;;  %v4263_v37 = vld [vmem:[%s4522_s17 + $0x18] sm:$0xff]  }
 0xad9   : > { %v4264_v38 = vld [vmem:[%s4522_s17 + $0x98] sm:$0xff]  }
 0xada   : > { %v4678_v2 = vadd.f32 %v3738_v39, %v1539_v40  ;;  %v4265_v39 = vld [vmem:[%s4522_s17 + $0x50] sm:$0xff]  }
 0xadb   : > { %v4266_v40 = vld [vmem:[%s4522_s17 + $0xd0] sm:$0xff]  }
 0xadc   : > { %v4682_v45 = vpack.c.bf16 %v4678_v2, %v4678_v2 }
 0xade   : > { %3771 = vmatmul.mubr.msk.bf16.vlgmr.msra.gmra.mxu1 %vm495_vm2, %v4682_v45  ;;  %3772 = vmatmul.mubr.msk.bf16.vlgmr.msra.gmra.mxu0 %vm495_vm2, %v4682_v45 }
 0xadf   : > { %1920 = vmatpush1.bf16.msra.mxu1 %v3759_v15  ;;  %1961 = vmatpush1.bf16.msra.mxu0 %v3761_v31  ;;  %v4256_v15 = vld [vmem:[%s4522_s17 + $0xa8] sm:$0xff]   ;;  %v4257_v31 = vld [vmem:[%s4522_s17 + $0x60] sm:$0xff]  }
 0xae0   : > { %1921 = vmatprep.subr.bf16.mxu1 %v3744_v46  ;;  %1962 = vmatprep.subr.bf16.mxu0 %v3746_v47  ;;  %v4272_v46 = vld [vmem:[%s4522_s17 + $0x88] sm:$0xff]   ;;  %v4273_v47 = vld [vmem:[%s4522_s17 + $0x40] sm:$0xff]  }
 0xae1   : > { %1939 = vmatprep.mubr.bf16.mxu1 %v4434_v29  ;;  %1980 = vmatprep.mubr.bf16.mxu0 %v4434_v29 }
 0xae3   : > { %1922 = vmatpush1.bf16.msra.mxu1 %v3743_v52  ;;  %1963 = vmatpush1.bf16.msra.mxu0 %v3745_v53  ;;  %v4278_v52 = vld [vmem:[%s4522_s17 + $0x1f8] sm:$0xff]   ;;  %v1582_v53 = vlaneseq }
 0xae4   : > { %2001 = vmatprep.subr.bf16.mxu1 %v3764_v24  ;;  %2042 = vmatprep.subr.bf16.mxu0 %v3766_v54 }
 0xae5   : > { %v4756_v24 = vshrl.u32 %v1582_v53, 7 }
 0xae6   : > { %3773 = vmatmul.mubr.msk.bf16.vlgmr.msra.gmra.mxu1 %vm495_vm2, %v4682_v45  ;;  %3774 = vmatmul.mubr.msk.bf16.vlgmr.msra.gmra.mxu0 %vm495_vm2, %v4682_v45 }
 0xae7   : > { %2002 = vmatpush1.bf16.msra.mxu1 %v3763_v59  ;;  %2043 = vmatpush1.bf16.msra.mxu0 %v3765_v60  ;;  %v1608_v54 = vsub.s32 6, %v4756_v24  ;;  %v1584_v57 = vsub.s32 0, %v4756_v24  ;;  %v1592_v58 = vsub.s32 2, %v4756_v24  ;;  %v4770_v59 = vld [vmem:[%s4527_s21] sm:$0xff]  ;;  %v1588_v60 = vsub.s32 1, %v4756_v24 }
 0xae8   : > { %2003 = vmatprep.subr.bf16.mxu1 %v3748_v61  ;;  %2044 = vmatprep.subr.bf16.mxu0 %v3750_v62  ;;  %v1596_v61 = vsub.s32 3, %v4756_v24  ;;  %v1604_v6 = vsub.s32 5, %v4756_v24 }
 0xae9   : > { %2021 = vmatprep.mubr.bf16.mxu1 %v4434_v29  ;;  %2062 = vmatprep.mubr.bf16.mxu0 %v4434_v29  ;;  %v4765_v56 = vrot.slane %v4760_v55, %v1608_v54  ;;  %v1585_v62 = vrot.slane %v4770_v59, %v1584_v57  ;;  %v1593_v63 = vrot.slane %v4770_v59, %v1592_v58 }
 0xaea   : > { %v1589_v0 = vrot.slane %v4770_v59, %v1588_v60  ;;  %v1597_v1 = vrot.slane %v4770_v59, %v1596_v61 }
 0xaeb   : > { %2004 = vmatpush1.bf16.msra.mxu1 %v3747_v4  ;;  %2045 = vmatpush1.bf16.msra.mxu0 %v3749_v5 }
 0xaec   : > { %2083 = vmatprep.subr.bf16.mxu1 %v3768_v7  ;;  %2124 = vmatprep.subr.bf16.mxu0 %v3770_v8 }
 0xaee   : > { %3775 = vmatmul.mubr.msk.bf16.vlgmr.msra.gmra.mxu1 %vm495_vm2, %v4682_v45  ;;  %3776 = vmatmul.mubr.msk.bf16.vlgmr.msra.gmra.mxu0 %vm495_vm2, %v4682_v45 }
 0xaef   : > { %2084 = vmatpush1.bf16.msra.mxu1 %v3767_v12  ;;  %2125 = vmatpush1.bf16.msra.mxu0 %v3769_v14  ;;  %v1612_v12 = vsub.s32 7, %v4756_v24 }
 0xaf0   : > { %2085 = vmatprep.subr.bf16.mxu1 %v3752_v16  ;;  %2126 = vmatprep.subr.bf16.mxu0 %v3754_v17 }
 0xaf1   : > { %2103 = vmatprep.mubr.bf16.mxu1 %v4434_v29  ;;  %2144 = vmatprep.mubr.bf16.mxu0 %v4434_v29  ;;  %v4253_v29 = vld [vmem:[%s4522_s17 + $0x68] sm:$0xff]  }
 0xaf3   : > { %2086 = vmatpush1.bf16.msra.mxu1 %v3751_v18  ;;  %2127 = vmatpush1.bf16.msra.mxu0 %v3753_v19 }
 0xaf4   : > { %3954 = vmatprep.subr.bf16.mxu1 %v4245_v20  ;;  %3976 = vmatprep.subr.bf16.mxu0 %v4246_v21 }
 0xaf6   : > { %3777 = vmatmul.mubr.msk.bf16.vlgmr.msra.gmra.mxu1 %vm495_vm2, %v4682_v45  ;;  %3778 = vmatmul.mubr.msk.bf16.vlgmr.msra.gmra.mxu0 %vm495_vm2, %v4682_v45  ;;  %v4271_v45 = vld [vmem:[%s4522_s17 + $0x8] sm:$0xff]  }
 0xaf7   : > { %3955 = vmatpush3.bf16.msra.mxu1 %v4247_v22  ;;  %3977 = vmatpush3.bf16.msra.mxu0 %v4248_v23 }
 0xaf8   : > { %3956 = vmatprep.subr.bf16.mxu1 %v4249_v25  ;;  %3978 = vmatprep.subr.bf16.mxu0 %v4250_v26  ;;  %v1605_v26 = vrot.slane %v4770_v59, %v1604_v6 }
 0xafb   : > { %3957 = vmatpush3.bf16.msra.mxu1 %v4251_v27  ;;  %3979 = vmatpush3.bf16.msra.mxu0 %v4252_v28  ;;  %v1613_v27 = vrot.slane %v4770_v59, %v1612_v12  ;;  %v4279_v28 = vld [vmem:[%s4522_s17 + $0x138] sm:$0xff]  }
 0xafc   : > { %3958 = vmatprep.subr.bf16.mxu1 %v4253_v29  ;;  %3980 = vmatprep.subr.bf16.mxu0 %v4254_v30  ;;  %v4280_v29 = vld [vmem:[%s4522_s17 + $0x1b8] sm:$0xff]  }
 0xaff   : > { %3959 = vmatpush3.bf16.msra.mxu1 %v4255_v13  ;;  %3981 = vmatpush3.bf16.msra.mxu0 %v4256_v15 }
 0xb00   : > { %3960 = vmatprep.subr.bf16.mxu1 %v4257_v31  ;;  %3982 = vmatprep.subr.bf16.mxu0 %v4258_v32  ;;  %v4281_v32 = vld [vmem:[%s4522_s17 + $0x170] sm:$0xff]  }
 0xb03   : > { %3961 = vmatpush3.bf16.msra.mxu1 %v4259_v33  ;;  %3983 = vmatpush3.bf16.msra.mxu0 %v4260_v34  ;;  %v4282_v33 = vld [vmem:[%s4522_s17 + $0x1f0] sm:$0xff]  }
 0xb04   : > { %3962 = vmatprep.subr.bf16.mxu1 %v4261_v35  ;;  %3984 = vmatprep.subr.bf16.mxu0 %v4262_v36 }
 0xb07   : > { %3963 = vmatpush3.bf16.msra.mxu1 %v4263_v37  ;;  %3985 = vmatpush3.bf16.msra.mxu0 %v4264_v38  ;;  %v4283_v38 = vld [vmem:[%s4522_s17 + $0x130] sm:$0xff]  }
 0xb08   : > { %3964 = vmatprep.subr.bf16.mxu1 %v4265_v39  ;;  %3986 = vmatprep.subr.bf16.mxu0 %v4266_v40  ;;  %v4284_v39 = vld [vmem:[%s4522_s17 + $0x1b0] sm:$0xff]  }
 0xb0b   : > { %3965 = vmatpush3.bf16.msra.mxu1 %v4267_v41  ;;  %3987 = vmatpush3.bf16.msra.mxu0 %v4268_v42  ;;  %v4285_v42 = vld [vmem:[%s4522_s17 + $0x168] sm:$0xff]  }
 0xb0c   : > { %3966 = vmatprep.subr.bf16.mxu1 %v4269_v43  ;;  %3988 = vmatprep.subr.bf16.mxu0 %v4270_v44  ;;  %v4286_v43 = vld [vmem:[%s4522_s17 + $0x1e8] sm:$0xff]  }
 0xb0f   : > { %3967 = vmatpush3.bf16.msra.mxu1 %v4271_v45  ;;  %3989 = vmatpush3.bf16.msra.mxu0 %v4272_v46 }
 0xb10   : > { %3968 = vmatprep.subr.bf16.mxu1 %v4273_v47  ;;  %3990 = vmatprep.subr.bf16.mxu0 %v4274_v48 }
 0xb13   : > { %3969 = vmatpush3.bf16.msra.mxu1 %v4275_v49  ;;  %3991 = vmatpush3.bf16.msra.mxu0 %v4276_v50  ;;  %v4287_v50 = vld [vmem:[%s4522_s17 + $0x128] sm:$0xff]  }
 0xb14   : > { %3998 = vmatprep.subr.bf16.mxu1 %v4277_v51  ;;  %4020 = vmatprep.subr.bf16.mxu0 %v4278_v52  ;;  %v4288_v51 = vld [vmem:[%s4522_s17 + $0x1a8] sm:$0xff]  }
 0xb9e   : > { %v1859_v3 = vpop.f32.mrf.mxu1  ;;  %v1900_v4 = vpop.f32.mrf.mxu0 }
 0xb9f   : > { %v1860_v5 = vadd.f32 %v1859_v3, %v1585_v62  ;;  %v1901_v7 = vadd.f32 %v1900_v4, %v1593_v63  ;;  %v4289_v62 = vld [vmem:[%s4522_s17 + $0x160] sm:$0xff]   ;;  %v1600_v3 = vsub.s32 4, %v4756_v24 }
 0xba0   : > { %v1861_v8 = vpop.f32.mrf.mxu1  ;;  %v1902_v9 = vpop.f32.mrf.mxu0  ;;  %v4290_v63 = vld [vmem:[%s4522_s17 + $0x1e0] sm:$0xff]  }
 0xba1   : > { %v1862_v10 = vadd.f32 %v1861_v8, %v1589_v0  ;;  %v1903_v11 = vadd.f32 %v1902_v9, %v1597_v1  ;;  %v2153_v14 = vmax.f32 %v1860_v5, 0.0  ;;  %v2155_v16 = vmax.f32 %v1901_v7, 0.0  ;;  %v4291_v4 = vld [vmem:[%s4522_s17 + $0x120] sm:$0xff]   ;;  %v4293_v9 = vld [vmem:[%s4522_s17 + $0x158] sm:$0xff]  }
 0xba2   : > { %v1863_v17 = vpop.f32.mrf.mxu1  ;;  %v1904_v18 = vpop.f32.mrf.mxu0  ;;  %v4292_v5 = vld [vmem:[%s4522_s17 + $0x1a0] sm:$0xff]  }
 0xba3   : > { %v2154_v19 = vmax.f32 %v1862_v10, 0.0  ;;  %v2156_v20 = vmax.f32 %v1903_v11, 0.0  ;;  %v2169_v30 = vpack.c.bf16 %v2153_v14, %v2153_v14  ;;  %v2171_v13 = vpack.c.bf16 %v2155_v16, %v2155_v16  ;;  %v4294_v10 = vld [vmem:[%s4522_s17 + $0x1d8] sm:$0xff]  }
 0xba4   : > { %v1864_v21 = vpop.f32.mrf.mxu1  ;;  %v1905_v22 = vpop.f32.mrf.mxu0  ;;  %v1633_v11 = vrot.slane %v4760_v55, %v1600_v3  ;;  %v4295_v17 = vld [vmem:[%s4522_s17 + $0x118] sm:$0xff]  }
 0xba5   : > { %v2170_v23 = vpack.c.bf16 %v2154_v19, %v2154_v19  ;;  %v2172_v25 = vpack.c.bf16 %v2156_v20, %v2156_v20  ;;  %v4296_v18 = vld [vmem:[%s4522_s17 + $0x198] sm:$0xff]   ;;  %v4297_v21 = vld [vmem:[%s4522_s17 + $0x150] sm:$0xff]  }
 0xba6   : > { %v4796_v15 = vpop.f32.mrf.mxu1  ;;  %v4798_v31 = vpop.f32.mrf.mxu0  ;;  %v4298_v22 = vld [vmem:[%s4522_s17 + $0x1d0] sm:$0xff]  }
 0xba7   : > { %3245 = vmatprep.mubr.bf16.mxu1 %v2170_v23  ;;  %3285 = vmatprep.mubr.bf16.mxu0 %v2172_v25 }
 0xba8   : > { %v1943_v34 = vpop.f32.mrf.mxu1  ;;  %v1984_v35 = vpop.f32.mrf.mxu0  ;;  %3246 = vmatmul.mubr.bf16.vlgmr.msra.gmra.mxu1 %v2169_v30  ;;  %3286 = vmatmul.mubr.bf16.vlgmr.msra.gmra.mxu0 %v2171_v13  ;;  %v1601_v30 = vrot.slane %v4770_v59, %v1600_v3  ;;  %v1609_v13 = vrot.slane %v4770_v59, %v1608_v54  ;;  %v4303_v54 = vld [vmem:[%s4522_s17 + $0x108] sm:$0xff]  }
 0xba9   : > { %v1944_v36 = vadd.f32 %v1943_v34, %v1605_v26  ;;  %v1985_v37 = vadd.f32 %v1984_v35, %v1613_v27  ;;  %3999 = vmatpush3.bf16.msra.mxu1 %v4279_v28  ;;  %4021 = vmatpush3.bf16.msra.mxu0 %v4280_v29  ;;  %v4299_v28 = vld [vmem:[%s4522_s17 + $0x110] sm:$0xff]   ;;  %v4302_v34 = vld [vmem:[%s4522_s17 + $0x1c8] sm:$0xff]   ;;  %v1621_v35 = vrot.slane %v4760_v55, %v1588_v60  ;;  %v4305_v60 = vld [vmem:[%s4522_s17 + $0x140] sm:$0xff]  }
 0xbaa   : > { %v1945_v40 = vpop.f32.mrf.mxu1  ;;  %v1986_v41 = vpop.f32.mrf.mxu0  ;;  %4000 = vmatprep.subr.bf16.mxu1 %v4281_v32  ;;  %4022 = vmatprep.subr.bf16.mxu0 %v4282_v33  ;;  %v4300_v29 = vld [vmem:[%s4522_s17 + $0x190] sm:$0xff]   ;;  %v4304_v59 = vld [vmem:[%s4522_s17 + $0x188] sm:$0xff]  }
 0xbab   : > { %v2158_v44 = vmax.f32 %v1944_v36, 0.0  ;;  %v2160_v45 = vmax.f32 %v1985_v37, 0.0  ;;  %v1629_v36 = vrot.slane %v4760_v55, %v1596_v61  ;;  %v1983_v40 = vadd.f32 %v4798_v31, %v1609_v13  ;;  %v4306_v41 = vld [vmem:[%s4522_s17 + $0x1c0] sm:$0xff]   ;;  %v4310_v31 = vld [vmem:[%s4522_s17 + $0x2f8] sm:$0xff]   ;;  %v4332_v13 = vld [vmem:[%s4522_s17 + $0x290] sm:$0xff]  }
 0xbac   : > { %v1946_v46 = vpop.f32.mrf.mxu1  ;;  %v1987_v47 = vpop.f32.mrf.mxu0 }
 0xbad   : > { %v2174_v48 = vpack.c.bf16 %v2158_v44, %v2158_v44  ;;  %v2176_v49 = vpack.c.bf16 %v2160_v45, %v2160_v45  ;;  %4001 = vmatpush3.bf16.msra.mxu1 %v4283_v38  ;;  %4023 = vmatpush3.bf16.msra.mxu0 %v4284_v39  ;;  %v1942_v39 = vadd.f32 %v4796_v15, %v1601_v30  ;;  %v4308_v44 = vld [vmem:[%s4522_s17 + $0x180] sm:$0xff]   ;;  %v2159_v46 = vmax.f32 %v1983_v40, 0.0  ;;  %v4309_v15 = vld [vmem:[%s4522_s17 + $0x278] sm:$0xff]  }
 0xbae   : > { %v4808_v52 = vpop.f32.mrf.mxu1  ;;  %v4810_v53 = vpop.f32.mrf.mxu0  ;;  %4002 = vmatprep.subr.bf16.mxu1 %v4285_v42  ;;  %4024 = vmatprep.subr.bf16.mxu0 %v4286_v43  ;;  %v4307_v43 = vld [vmem:[%s4522_s17 + $0x100] sm:$0xff]   ;;  %v1617_v30 = vrot.slane %v4760_v55, %v1584_v57  ;;  %v1645_v57 = vrot.slane %v4760_v55, %v1612_v12 }
 0xbaf   : > { %3325 = vmatprep.mubr.bf16.mxu1 %v2174_v48  ;;  %3365 = vmatprep.mubr.bf16.mxu0 %v2176_v49  ;;  %v2157_v45 = vmax.f32 %v1942_v39, 0.0  ;;  %v4311_v49 = vld [vmem:[%s4522_s17 + $0x238] sm:$0xff]  }
 0xbb0   : > { %v2025_v0 = vpop.f32.mrf.mxu1  ;;  %v2066_v1 = vpop.f32.mrf.mxu0 }
 0xbb1   : > { %4003 = vmatpush3.bf16.msra.mxu1 %v4287_v50  ;;  %4025 = vmatpush3.bf16.msra.mxu0 %v4288_v51  ;;  %v2026_v42 = vadd.f32 %v2025_v0, %v1621_v35  ;;  %v2067_v61 = vadd.f32 %v2066_v1, %v1629_v36  ;;  %v2173_v50 = vpack.c.bf16 %v2157_v45, %v2157_v45  ;;  %v4313_v0 = vld [vmem:[%s4522_s17 + $0x270] sm:$0xff]   ;;  %v4335_v35 = vld [vmem:[%s4522_s17 + $0x208] sm:$0xff]  }
 0xbb2   : > { %v2027_v7 = vpop.f32.mrf.mxu1  ;;  %v2068_v8 = vpop.f32.mrf.mxu0  ;;  %4004 = vmatprep.subr.bf16.mxu1 %v4289_v62  ;;  %4026 = vmatprep.subr.bf16.mxu0 %v4290_v63  ;;  %v2175_v51 = vpack.c.bf16 %v2159_v46, %v2159_v46  ;;  %v4312_v62 = vld [vmem:[%s4522_s17 + $0x2b8] sm:$0xff]   ;;  %v4314_v1 = vld [vmem:[%s4522_s17 + $0x2f0] sm:$0xff]   ;;  %v2024_v36 = vadd.f32 %v4808_v52, %v1617_v30  ;;  %v4340_v52 = vld [vmem:[%s4522_s17 + $0x280] sm:$0xff]  }
 0xbb3   : > { %v2162_v47 = vmax.f32 %v2026_v42, 0.0  ;;  %v2164_v48 = vmax.f32 %v2067_v61, 0.0  ;;  %v4317_v7 = vld [vmem:[%s4522_s17 + $0x268] sm:$0xff]   ;;  %v4345_v61 = vld [vmem:[%s4522_s17 + $0x370] sm:$0xff]  }
 0xbb4   : > { %v2028_v14 = vpop.f32.mrf.mxu1  ;;  %v2069_v16 = vpop.f32.mrf.mxu0  ;;  %v4318_v8 = vld [vmem:[%s4522_s17 + $0x2e8] sm:$0xff]   ;;  %v2161_v12 = vmax.f32 %v2024_v36, 0.0  ;;  %v4347_v46 = vld [vmem:[%s4522_s17 + $0x330] sm:$0xff]  }
 0xbb5   : > { %4005 = vmatpush3.bf16.msra.mxu1 %v4291_v4  ;;  %4027 = vmatpush3.bf16.msra.mxu0 %v4292_v5  ;;  %v2178_v63 = vpack.c.bf16 %v2162_v47, %v2162_v47  ;;  %v2180_v3 = vpack.c.bf16 %v2164_v48, %v2164_v48  ;;  %v4315_v4 = vld [vmem:[%s4522_s17 + $0x230] sm:$0xff]   ;;  %v4322_v14 = vld [vmem:[%s4522_s17 + $0x2e0] sm:$0xff]   ;;  %v4350_v47 = vld [vmem:[%s4522_s17 + $0x3e8] sm:$0xff]  }
 0xbb6   : > { %v2105_v19 = vpop.f32.mrf.mxu1  ;;  %v2146_v20 = vpop.f32.mrf.mxu0  ;;  %4006 = vmatprep.subr.bf16.mxu1 %v4293_v9  ;;  %4028 = vmatprep.subr.bf16.mxu0 %v4294_v10  ;;  %v4316_v5 = vld [vmem:[%s4522_s17 + $0x2b0] sm:$0xff]   ;;  %v4319_v9 = vld [vmem:[%s4522_s17 + $0x228] sm:$0xff]   ;;  %v4323_v16 = vld [vmem:[%s4522_s17 + $0x220] sm:$0xff]  }
 0xbb7   : > { %v4824_v23 = vadd.f32 %v2105_v19, %v1633_v11  ;;  %v4827_v25 = vadd.f32 %v2146_v20, %v4765_v56  ;;  %v4301_v56 = vld [vmem:[%s4522_s17 + $0x148] sm:$0xff]   ;;  %v4321_v11 = vld [vmem:[%s4522_s17 + $0x260] sm:$0xff]   ;;  %v4326_v19 = vld [vmem:[%s4522_s17 + $0x2d8] sm:$0xff]  }
 0xbb8   : > { %v4829_v26 = vpop.f32.mrf.mxu1  ;;  %v4831_v27 = vpop.f32.mrf.mxu0  ;;  %v4320_v10 = vld [vmem:[%s4522_s17 + $0x2a8] sm:$0xff]   ;;  %v4327_v20 = vld [vmem:[%s4522_s17 + $0x218] sm:$0xff]  }
 0xbb9   : > { %4007 = vmatpush3.bf16.msra.mxu1 %v4295_v17  ;;  %4029 = vmatpush3.bf16.msra.mxu0 %v4296_v18  ;;  %v4324_v17 = vld [vmem:[%s4522_s17 + $0x2a0] sm:$0xff]   ;;  %v4325_v18 = vld [vmem:[%s4522_s17 + $0x258] sm:$0xff]   ;;  %v4351_v48 = vld [vmem:[%s4522_s17 + $0x328] sm:$0xff]  }
 0xbba   : > { %v2109_v32 = vpop.f32.mrf.mxu1  ;;  %v2150_v33 = vpop.f32.mrf.mxu0  ;;  %4008 = vmatprep.subr.bf16.mxu1 %v4297_v21  ;;  %4030 = vmatprep.subr.bf16.mxu0 %v4298_v22  ;;  %v4328_v21 = vld [vmem:[%s4522_s17 + $0x298] sm:$0xff]   ;;  %v4329_v22 = vld [vmem:[%s4522_s17 + $0x250] sm:$0xff]  }
 0xbbb   : > { %v4333_v32 = vld [vmem:[%s4522_s17 + $0x248] sm:$0xff]   ;;  %v1625_v33 = vrot.slane %v4760_v55, %v1592_v58 }
 0xbbc   : > { %v2110_v37 = vpop.f32.mrf.mxu1  ;;  %v2151_v38 = vpop.f32.mrf.mxu0  ;;  %v4336_v58 = vld [vmem:[%s4522_s17 + $0x288] sm:$0xff]  }
 0xbbd   : > { %4009 = vmatpush3.bf16.msra.mxu1 %v4299_v28  ;;  %4031 = vmatpush3.bf16.msra.mxu0 %v4300_v29  ;;  %v4330_v28 = vld [vmem:[%s4522_s17 + $0x2d0] sm:$0xff]   ;;  %v4337_v37 = vld [vmem:[%s4522_s17 + $0x240] sm:$0xff]   ;;  %v2065_v38 = vadd.f32 %v4810_v53, %v1625_v33  ;;  %v4342_v53 = vld [vmem:[%s4522_s17 + $0x3f8] sm:$0xff]  }
 0xbbe   : > { %4010 = vmatprep.subr.bf16.mxu1 %v4301_v56  ;;  %4032 = vmatprep.subr.bf16.mxu0 %v4302_v34  ;;  %v4331_v29 = vld [vmem:[%s4522_s17 + $0x210] sm:$0xff]   ;;  %v4334_v56 = vld [vmem:[%s4522_s17 + $0x2c8] sm:$0xff]   ;;  %v1637_v34 = vrot.slane %v4760_v55, %v1604_v6  ;;  %v2149_v55 = vadd.f32 %v4831_v27, %v1645_v57  ;;  %v4339_v6 = vld [vmem:[%s4522_s17 + $0x200] sm:$0xff]  }
 0xbbf   : > { %v2163_v39 = vmax.f32 %v2065_v38, 0.0  ;;  %v4344_v27 = vld [vmem:[%s4522_s17 + $0x3b8] sm:$0xff]  }
 0xbc0   : > { %v2108_v24 = vadd.f32 %v4829_v26, %v1637_v34  ;;  %v4343_v26 = vld [vmem:[%s4522_s17 + $0x338] sm:$0xff]  }
 0xbc1   : > { %4011 = vmatpush3.bf16.msra.mxu1 %v4303_v54  ;;  %4033 = vmatpush3.bf16.msra.mxu0 %v4304_v59  ;;  %v4338_v54 = vld [vmem:[%s4522_s17 + $0x2c0] sm:$0xff]   ;;  %v4341_v59 = vld [vmem:[%s4522_s17 + $0x378] sm:$0xff]   ;;  %v2179_v42 = vpack.c.bf16 %v2163_v39, %v2163_v39 }
 0xbc2   : > { %4012 = vmatprep.subr.bf16.mxu1 %v4305_v60  ;;  %4034 = vmatprep.subr.bf16.mxu0 %v4306_v41  ;;  %v2166_v40 = vmax.f32 %v2108_v24, 0.0  ;;  %v2168_v60 = vmax.f32 %v2149_v55, 0.0  ;;  %v2177_v41 = vpack.c.bf16 %v2161_v12, %v2161_v12 }
 0xbc4   : > { %v2184_v45 = vpack.c.bf16 %v2168_v60, %v2168_v60 }
 0xbc5   : > { %4013 = vmatpush3.bf16.msra.mxu1 %v4307_v43  ;;  %4035 = vmatpush3.bf16.msra.mxu0 %v4308_v44  ;;  %v2182_v43 = vpack.c.bf16 %v2166_v40, %v2166_v40  ;;  %v4346_v44 = vld [vmem:[%s4522_s17 + $0x3f0] sm:$0xff]  }
 0xbc6   : > { %4042 = vmatprep.subr.bf16.mxu1 %v4309_v15  ;;  %4064 = vmatprep.subr.bf16.mxu0 %v4310_v31  ;;  %v4348_v15 = vld [vmem:[%s4522_s17 + $0x3b0] sm:$0xff]   ;;  %v4349_v31 = vld [vmem:[%s4522_s17 + $0x368] sm:$0xff]  }
 0xbc8   : > { %3326 = vmatmul.mubr.bf16.vlgmr.msra.gmra.mxu1 %v2173_v50  ;;  %3366 = vmatmul.mubr.bf16.vlgmr.msra.gmra.mxu0 %v2175_v51  ;;  %v4353_v50 = vld [vmem:[%s4522_s17 + $0x360] sm:$0xff]  }
 0xbc9   : > { %4043 = vmatpush3.bf16.msra.mxu1 %v4311_v49  ;;  %3405 = vmatprep.mubr.bf16.mxu1 %v2178_v63  ;;  %v4352_v49 = vld [vmem:[%s4522_s17 + $0x3a8] sm:$0xff]   ;;  %v4354_v51 = vld [vmem:[%s4522_s17 + $0x3e0] sm:$0xff]  }
 0xbca   : > { %4065 = vmatpush3.bf16.msra.mxu0 %v4312_v62  ;;  %3445 = vmatprep.mubr.bf16.mxu0 %v2180_v3  ;;  %v4355_v62 = vld [vmem:[%s4522_s17 + $0x320] sm:$0xff]   ;;  %v4359_v3 = vld [vmem:[%s4522_s17 + $0x318] sm:$0xff]  }
 0xbcb   : > { %4044 = vmatprep.subr.bf16.mxu1 %v4313_v0  ;;  %4066 = vmatprep.subr.bf16.mxu0 %v4314_v1  ;;  %v4356_v63 = vld [vmem:[%s4522_s17 + $0x3a0] sm:$0xff]   ;;  %v4357_v0 = vld [vmem:[%s4522_s17 + $0x358] sm:$0xff]  }
 0xbcc   : > { %v4358_v1 = vld [vmem:[%s4522_s17 + $0x3d8] sm:$0xff]  }
 0xbcd   : > { %4045 = vmatpush3.bf16.msra.mxu1 %v4315_v4  ;;  %v4360_v4 = vld [vmem:[%s4522_s17 + $0x398] sm:$0xff]  }
 0xbce   : > { %4067 = vmatpush3.bf16.msra.mxu0 %v4316_v5  ;;  %4046 = vmatprep.subr.bf16.mxu1 %v4317_v7  ;;  %v4361_v5 = vld [vmem:[%s4522_s17 + $0x350] sm:$0xff]  }
 0xbcf   : > { %4068 = vmatprep.subr.bf16.mxu0 %v4318_v8  ;;  %v4362_v7 = vld [vmem:[%s4522_s17 + $0x3d0] sm:$0xff]  }
 0xbd0   : > { %v4363_v8 = vld [vmem:[%s4522_s17 + $0x310] sm:$0xff]  }
 0xbd1   : > { %4047 = vmatpush3.bf16.msra.mxu1 %v4319_v9  ;;  %v4364_v9 = vld [vmem:[%s4522_s17 + $0x390] sm:$0xff]  }
 0xbd2   : > { %4069 = vmatpush3.bf16.msra.mxu0 %v4320_v10  ;;  %4048 = vmatprep.subr.bf16.mxu1 %v4321_v11  ;;  %v4365_v10 = vld [vmem:[%s4522_s17 + $0x348] sm:$0xff]  }
 0xbd3   : > { %4070 = vmatprep.subr.bf16.mxu0 %v4322_v14  ;;  %v4366_v11 = vld [vmem:[%s4522_s17 + $0x3c8] sm:$0xff]  }
 0xbd4   : > { %v4367_v14 = vld [vmem:[%s4522_s17 + $0x308] sm:$0xff]  }
 0xbd5   : > { %4049 = vmatpush3.bf16.msra.mxu1 %v4323_v16  ;;  %v4368_v16 = vld [vmem:[%s4522_s17 + $0x388] sm:$0xff]  }
 0xbd6   : > { %4071 = vmatpush3.bf16.msra.mxu0 %v4324_v17  ;;  %4050 = vmatprep.subr.bf16.mxu1 %v4325_v18  ;;  %v4369_v17 = vld [vmem:[%s4522_s17 + $0x340] sm:$0xff]  }
 0xbd7   : > { %4072 = vmatprep.subr.bf16.mxu0 %v4326_v19  ;;  %v4370_v18 = vld [vmem:[%s4522_s17 + $0x3c0] sm:$0xff]  }
 0xbd8   : > { %v4371_v19 = vld [vmem:[%s4522_s17 + $0x300] sm:$0xff]  }
 0xbd9   : > { %4051 = vmatpush3.bf16.msra.mxu1 %v4327_v20  ;;  %v2165_v20 = vmax.f32 %v4824_v23, 0.0 }
 0xbda   : > { %4073 = vmatpush3.bf16.msra.mxu0 %v4328_v21  ;;  %4052 = vmatprep.subr.bf16.mxu1 %v4329_v22  ;;  %v4372_v21 = vld [vmem:[%s4522_s17 + $0x380] sm:$0xff]   ;;  %v2167_v22 = vmax.f32 %v4827_v25, 0.0 }
 0xbdb   : > { %4074 = vmatprep.subr.bf16.mxu0 %v4330_v28  ;;  %v2181_v28 = vpack.c.bf16 %v2165_v20, %v2165_v20 }
 0xbdd   : > { %4053 = vmatpush3.bf16.msra.mxu1 %v4331_v29  ;;  %v2183_v29 = vpack.c.bf16 %v2167_v22, %v2167_v22  ;;  %v3908_v22 = vld [vmem:[%s4532_s24 + $0x7] ss:$0 sm:$0xff] }
 0xbde   : > { %4075 = vmatpush3.bf16.msra.mxu0 %v4332_v13  ;;  %4054 = vmatprep.subr.bf16.mxu1 %v4333_v32  ;;  %v3779_v32 = vld [vmem:[%s4532_s24 + $0x4] ss:$0 sm:$0xff] }
 0xbdf   : > { %4076 = vmatprep.subr.bf16.mxu0 %v4334_v56 }
 0xbe1   : > { %4055 = vmatpush3.bf16.msra.mxu1 %v4335_v35 }
 0xbe2   : > { %4077 = vmatpush3.bf16.msra.mxu0 %v4336_v58  ;;  %4056 = vmatprep.subr.bf16.mxu1 %v4337_v37 }
 0xbe3   : > { %4078 = vmatprep.subr.bf16.mxu0 %v4338_v54 }
 0xbe5   : > { %4057 = vmatpush3.bf16.msra.mxu1 %v4339_v6 }
 0xbe6   : > { %4079 = vmatpush3.bf16.msra.mxu0 %v4340_v52  ;;  %4086 = vmatprep.subr.bf16.mxu1 %v4341_v59 }
 0xbe7   : > { %4108 = vmatprep.subr.bf16.mxu0 %v4342_v53 }
 0xbe8   : > { %3406 = vmatmul.mubr.bf16.vlgmr.msra.gmra.mxu1 %v2177_v41 }
 0xbe9   : > { %3446 = vmatmul.mubr.bf16.vlgmr.msra.gmra.mxu0 %v2179_v42  ;;  %4087 = vmatpush3.bf16.msra.mxu1 %v4343_v26 }
 0xbea   : > { %3485 = vmatprep.mubr.bf16.mxu1 %v2182_v43  ;;  %4109 = vmatpush3.bf16.msra.mxu0 %v4344_v27 }
 0xbeb   : > { %3525 = vmatprep.mubr.bf16.mxu0 %v2184_v45  ;;  %4088 = vmatprep.subr.bf16.mxu1 %v4345_v61 }
 0xbec   : > { %4110 = vmatprep.subr.bf16.mxu0 %v4346_v44 }
 0xbed   : > { %4089 = vmatpush3.bf16.msra.mxu1 %v4347_v46 }
 0xbee   : > { %4111 = vmatpush3.bf16.msra.mxu0 %v4348_v15  ;;  %4090 = vmatprep.subr.bf16.mxu1 %v4349_v31 }
 0xbef   : > { %4112 = vmatprep.subr.bf16.mxu0 %v4350_v47 }
 0xbf1   : > { %4091 = vmatpush3.bf16.msra.mxu1 %v4351_v48 }
 0xbf2   : > { %4113 = vmatpush3.bf16.msra.mxu0 %v4352_v49  ;;  %4092 = vmatprep.subr.bf16.mxu1 %v4353_v50 }
 0xbf3   : > { %4114 = vmatprep.subr.bf16.mxu0 %v4354_v51 }
 0xbf5   : > { %4093 = vmatpush3.bf16.msra.mxu1 %v4355_v62 }
 0xbf6   : > { %4115 = vmatpush3.bf16.msra.mxu0 %v4356_v63  ;;  %4094 = vmatprep.subr.bf16.mxu1 %v4357_v0 }
 0xbf7   : > { %4116 = vmatprep.subr.bf16.mxu0 %v4358_v1 }
 0xbf9   : > { %4095 = vmatpush3.bf16.msra.mxu1 %v4359_v3 }
 0xbfa   : > { %4117 = vmatpush3.bf16.msra.mxu0 %v4360_v4  ;;  %4096 = vmatprep.subr.bf16.mxu1 %v4361_v5 }
 0xbfb   : > { %4118 = vmatprep.subr.bf16.mxu0 %v4362_v7 }
 0xbfd   : > { %4097 = vmatpush3.bf16.msra.mxu1 %v4363_v8 }
 0xbfe   : > { %4119 = vmatpush3.bf16.msra.mxu0 %v4364_v9  ;;  %4098 = vmatprep.subr.bf16.mxu1 %v4365_v10 }
 0xbff   : > { %4120 = vmatprep.subr.bf16.mxu0 %v4366_v11 }
 0xc01   : > { %4099 = vmatpush3.bf16.msra.mxu1 %v4367_v14 }
 0xc02   : > { %4121 = vmatpush3.bf16.msra.mxu0 %v4368_v16  ;;  %4100 = vmatprep.subr.bf16.mxu1 %v4369_v17 }
 0xc03   : > { %4122 = vmatprep.subr.bf16.mxu0 %v4370_v18 }
 0xc05   : > { %4101 = vmatpush3.bf16.msra.mxu1 %v4371_v19 }
 0xc06   : > { %4123 = vmatpush3.bf16.msra.mxu0 %v4372_v21 }
 0xc08   : > { %3486 = vmatmul.mubr.bf16.vlgmr.msra.gmra.mxu1 %v2181_v28  ;;  %v3909_v28 = vld [vmem:[%s4532_s24 + $0x8] ss:$0 sm:$0xff] }
 0xc09   : > { %3526 = vmatmul.mubr.bf16.vlgmr.msra.gmra.mxu0 %v2183_v29 }
 0xc68   : > { %v3970_v30 = vpop.f32.mrf.mxu1  ;;  %v3992_v13 = vpop.f32.mrf.mxu0 }
 0xc6a   : > { %v3971_v33 = vpop.f32.mrf.mxu1  ;;  %v3993_v56 = vpop.f32.mrf.mxu0 }
 0xc6b   : > { %v3972_v34 = vadd.f32 %v3971_v33, %v3970_v30  ;;  %v3994_v57 = vadd.f32 %v3993_v56, %v3992_v13 }
 0xc6c   : > { %v3973_v23 = vpop.f32.mrf.mxu1  ;;  %v3995_v35 = vpop.f32.mrf.mxu0 }
 0xc6d   : > { %v3248_v36 = vadd.f32 %v3972_v34, %v3779_v32 }
 0xc6e   : > { %v3974_v58 = vpop.f32.mrf.mxu1  ;;  %v3996_v37 = vpop.f32.mrf.mxu0 }
 0xc6f   : > { %v3288_v25 = vadd.f32 %v3994_v57, %v3248_v36 }
 0xc88   : > { %v4014_v38 = vpop.f32.mrf.mxu1  ;;  %v4036_v54 = vpop.f32.mrf.mxu0 }
 0xc8a   : > { %v4015_v24 = vpop.f32.mrf.mxu1  ;;  %v4037_v55 = vpop.f32.mrf.mxu0 }
 0xc8b   : > { %v4016_v61 = vadd.f32 %v4015_v24, %v4014_v38  ;;  %v4038_v44 = vadd.f32 %v4037_v55, %v4036_v54 }
 0xc8c   : > { %v4017_v6 = vpop.f32.mrf.mxu1  ;;  %v4039_v12 = vpop.f32.mrf.mxu0 }
 0xc8d   : > { %v3328_v43 = vadd.f32 %v4016_v61, %v3288_v25 }
 0xc8e   : > { %v4018_v52 = vpop.f32.mrf.mxu1  ;;  %v4040_v59 = vpop.f32.mrf.mxu0 }
 0xc8f   : > { %v3368_v46 = vadd.f32 %v4038_v44, %v3328_v43 }
 0xca8   : > { %v4058_v39 = vpop.f32.mrf.mxu1 }
 0xca9   : > { %v4080_v53 = vpop.f32.mrf.mxu0 }
 0xcaa   : > { %v4059_v40 = vpop.f32.mrf.mxu1 }
 0xcab   : > { %v4081_v60 = vpop.f32.mrf.mxu0  ;;  %v4060_v45 = vadd.f32 %v4059_v40, %v4058_v39 }
 0xcac   : > { %v4061_v26 = vpop.f32.mrf.mxu1  ;;  %v4082_v47 = vadd.f32 %v4081_v60, %v4080_v53 }
 0xcad   : > { %v4083_v41 = vpop.f32.mrf.mxu0  ;;  %v3408_v15 = vadd.f32 %v4060_v45, %v3368_v46 }
 0xcae   : > { %v4062_v27 = vpop.f32.mrf.mxu1 }
 0xcaf   : > { %v4084_v42 = vpop.f32.mrf.mxu0  ;;  %v3448_v50 = vadd.f32 %v4082_v47, %v3408_v15 }
 0xcc8   : > { %v4102_v31 = vpop.f32.mrf.mxu1 }
 0xcc9   : > { %v4124_v48 = vpop.f32.mrf.mxu0 }
 0xcca   : > { %v4103_v49 = vpop.f32.mrf.mxu1 }
 0xccb   : > { %v4104_v51 = vadd.f32 %v4103_v49, %v4102_v31  ;;  %v4125_v62 = vpop.f32.mrf.mxu0 }
 0xccc   : > { %v4105_v63 = vpop.f32.mrf.mxu1  ;;  %v4126_v1 = vadd.f32 %v4125_v62, %v4124_v48 }
 0xccd   : > { %v3488_v0 = vadd.f32 %v4104_v51, %v3448_v50  ;;  %v4127_v3 = vpop.f32.mrf.mxu0 }
 0xcce   : > { %v4106_v4 = vpop.f32.mrf.mxu1 }
 0xccf   : > { %v3528_v5 = vadd.f32 %v4126_v1, %v3488_v0  ;;  %v4128_v7 = vpop.f32.mrf.mxu0 }
 0xcd1   : > { %v3533_v8 = vadd.f32 %v3528_v5, %v4678_v2 }
 0xcd3   : > { %v3534_v9 = vsel %vm495_vm2, %v3533_v8, 0.0 }
 0xcd4   : > { %3535 = vadd.xlane.f32.xlu0 %v3534_v9 }
 0xd5d   : > { %v3536_v10 = vpop.xlane.xlu0 %3535 }
 0xd5e   : > { %v3537_v11 = vmul.f32 0.03125, %v3536_v10 }
 0xd60   : > { %v3538_v14 = vsub.f32 %v3533_v8, %v3537_v11 }
 0xd62   : > { %v3539_v16 = vmul.f32 %v3538_v14, %v3538_v14 }
 0xd64   : > { %v3540_v17 = vsel %vm495_vm2, %v3539_v16, 0.0 }
 0xd65   : > { %3541 = vadd.xlane.f32.xlu0 %v3540_v17 }
 0xdee   : > { %v3542_v18 = vpop.xlane.xlu0 %3541 }
 0xdef   : > { %v3543_v19 = vmul.f32 0.03125, %v3542_v18 }
 0xdf1   : > { %v3544_v20 = vadd.f32 1e-05, %v3543_v19 }
 0xdf3   : > { %4391 = vrsqrt.f32 %v3544_v20 }
 0xe00   : > { %v4392_v21 = vpop.eup %4391 }
 0xe01   : > { %v3546_v2 = vmul.f32 %v4392_v21, %v3538_v14 }
 0xe03   : > { %v3551_v29 = vmul.f32 %v3908_v22, %v3546_v2 }
 0xe05   : > { %v3556_v30 = vadd.f32 %v3909_v28, %v3551_v29 }
 0xe07   : > { %3557 = vst.msk [vmem:[#allocation2] sm:$0xff] %vm495_vm2, %v3556_v30 }
 0xe08   : > { %4406 = shalt.err (!%p4403_p12)
}
 0xe09   : > { %4219 = dma.vmem_to_hbm [thread:$0]  (%p4222_p5), %s3566_s22, 128, %s4968_s9, [#allocation3]  }
 0xe0a   : > { %4422 = dma.done.wait (%p4222_p5), [#allocation3], 128  }
 0xe0b   : > { %4424 = vsyncadd (%p4222_p5), [#allocation3], 4294967168 }
 0xe0c PF: > { %s20_s30 = sadd.s32 1, %s4427_s30  }
 0xe0d   : > { %p17_p13 = scmp.ge.s32.totalorder %s20_s30, 4  }
 0xe0f   :  { %19 = sbr.rel (!%p17_p13) target bundleno = 3 (0x3), region = 108 }
 0xe14   :  { %3578 = vsyncpa [#allocation3], 1 }
 0xe15   :  { %3580 = vsyncpa [#allocation3 + $0x1], 1 }

</bundles_post_ra>
